<compile_context>
chip_gen: v5e
topology: v5e:2x2
jax: 0.10.0
libtpu: 0.0.40
codegen_flags: <defaults>
</compile_context>

<pallas_src>
import functools

import jax
import jax.numpy as jnp
import numpy as np
from jax.experimental import pallas as pl
from jax.experimental.pallas import tpu as pltpu


def _spatial_attn_kernel(x_ref, cls_ref, w_ref, o_ref, *, heads, head_dim):
    B, T, N, D = x_ref.shape
    M = cls_ref.shape[2]
    H, hd = heads, head_dim
    hid = H * hd
    BT = B * T

    x = x_ref[...]            # (B, T, N, D)    bf16
    cm = cls_ref[...]         # (B, T, M, N)    bf16
    w = w_ref[...]            # (3, H, D, hd)   bf16 (scale folded into w[0])

    # ---- head-batched q/k/v projection (no transposes, no lane slicing) ----
    x2 = x.reshape(BT * N, D)
    xh = jnp.broadcast_to(x2[None], (H, BT * N, D))     # H-way replicate (small)

    def proj(wi):                                        # wi: (H, D, hd)
        y = jnp.einsum("hnd,hde->hne", xh, wi,
                       preferred_element_type=jnp.float32)   # (H, BT*N, hd) f32
        return y.reshape(H * BT, N, hd).astype(jnp.bfloat16)

    q = proj(w[0])            # scale already folded into the q weight
    k = proj(w[1])
    v = proj(w[2])

    # ---- batched attention over all (head, b, t) problems at once ----------
    s = jnp.einsum("bqd,bkd->bqk", q, k,
                   preferred_element_type=jnp.float32)        # (H*BT, N, N) f32
    s = s - jnp.max(s, axis=-1, keepdims=True)
    p = jnp.exp(s)
    p = p * pl.reciprocal(jnp.sum(p, axis=-1, keepdims=True), approx=True)
    # attn_drop == 0.0 -> dropout is identity.

    ctx = jnp.einsum("bqk,bkd->bqd", p.astype(jnp.bfloat16), v,
                     preferred_element_type=jnp.float32)      # (H*BT, N, hd) f32

    # ---- cls_map contraction, batched over (head, b, t); kept in f32 -------
    cmb = jnp.broadcast_to(cm.reshape(BT, M, N)[None], (H, BT, M, N))
    cmb = cmb.reshape(H * BT, M, N).astype(jnp.float32)
    oh = jnp.einsum("bmn,bnd->bmd", cmb, ctx,
                    preferred_element_type=jnp.float32)       # (H*BT, M, hd) f32
    oh = oh.reshape(H, BT, M, hd)

    # ---- merge heads along lanes (head-major order == PyTorch reshape) -----
    out = jnp.concatenate([oh[h] for h in range(H)], axis=-1)  # (BT, M, hid)

    # Lane-dense store: (B, T, M*hid).
    o_ref[...] = out.reshape(B, T, M * hid).astype(o_ref.dtype)


def spatial_attn(x, cls_map, wq, wk, wv, *, heads):
    """x: (B,T,N,D) f32, cls_map: (B,T,M,N) f32, w*: (hid,D) f32 -> (B,T,M,hid) f32."""
    B, T, N, D = x.shape
    M = cls_map.shape[2]
    hid = wq.shape[0]
    hd = hid // heads
    scale = hd ** (-0.5)

    # Conv2d(., ., 1, bias=False) weight (hid, D) -> per-head (H, D, hd).
    def per_head(w):
        return w.reshape(heads, hd, D).transpose(0, 2, 1)      # (H, D, hd)

    # Fold `scale` into the q weight; stack q/k/v along a leading axis so the
    # kernel slices heads/projections on major dims only (never on lanes).
    w_stack = jnp.stack(
        [per_head(wq * scale), per_head(wk), per_head(wv)], axis=0
    ).astype(jnp.bfloat16)                                      # (3, H, D, hd)

    kernel = functools.partial(_spatial_attn_kernel, heads=heads, head_dim=hd)

    out_flat = pl.pallas_call(
        kernel,
        out_shape=jax.ShapeDtypeStruct((B, T, M * hid), jnp.float32),
        grid=(1,),
        in_specs=[
            pl.BlockSpec((B, T, N, D), lambda i: (0, 0, 0, 0)),
            pl.BlockSpec((B, T, M, N), lambda i: (0, 0, 0, 0)),
            pl.BlockSpec((3, heads, D, hd), lambda i: (0, 0, 0, 0)),
        ],
        out_specs=pl.BlockSpec((B, T, M * hid), lambda i: (0, 0, 0)),
        compiler_params=pltpu.CompilerParams(
            dimension_semantics=("arbitrary",)),
    )(x.astype(jnp.bfloat16), cls_map.astype(jnp.bfloat16), w_stack)

    return out_flat.reshape(B, T, M, hid)


def spatial_attn_ref(x, cls_map, wq, wk, wv, *, heads):
    """Pure-JAX f32 reference mirroring the PyTorch forward."""
    B, T, N, D = x.shape
    M = cls_map.shape[2]
    hid = wq.shape[0]
    hd = hid // heads
    scale = hd ** (-0.5)

    def proj(w):
        y = jnp.einsum("btnd,hd->btnh", x, w)                          # (B,T,N,hid)
        return y.reshape(B, T, N, heads, hd).transpose(0, 1, 3, 2, 4)  # (B,T,H,N,hd)

    q, k, v = proj(wq), proj(wk), proj(wv)
    attn = jnp.einsum("bthnd,bthmd->bthnm", q, k) * scale
    attn = jax.nn.softmax(attn, axis=-1)
    out = jnp.einsum("bthnm,bthmd->bthnd", attn, v)                    # (B,T,H,N,hd)
    cm = jnp.broadcast_to(cls_map[:, :, None, :, :], (B, T, heads, M, N))
    out = jnp.einsum("bthmn,bthnd->bthmd", cm, out)                    # (B,T,H,M,hd)
    out = out.transpose(0, 1, 3, 2, 4).reshape(B, T, M, hid)
    return out


if __name__ == "__main__":
    # Small shapes consistent with the module's forward.
    B, T, N, D = 2, 3, 16, 8      # x: (B, T, N, D)
    M = 5                          # number of "cls" rows in cls_map
    hid_dim, heads = 32, 4         # head_dim = 8

    key = jax.random.PRNGKey(0)
    kx, kc, kq, kk, kv = jax.random.split(key, 5)
    x = jax.random.normal(kx, (B, T, N, D), dtype=jnp.float32)
    cls_map = jax.random.normal(kc, (B, T, M, N), dtype=jnp.float32)
    # Conv2d(q_dim, hid_dim, kernel_size=1, bias=False) weight -> (hid_dim, D)
    wq = jax.random.normal(kq, (hid_dim, D), dtype=jnp.float32) * 0.1
    wk = jax.random.normal(kk, (hid_dim, D), dtype=jnp.float32) * 0.1
    wv = jax.random.normal(kv, (hid_dim, D), dtype=jnp.float32) * 0.1

    out = jax.block_until_ready(spatial_attn(x, cls_map, wq, wk, wv, heads=heads))
    ref = jax.block_until_ready(spatial_attn_ref(x, cls_map, wq, wk, wv, heads=heads))

    assert out.shape == (B, T, M, hid_dim), out.shape
    # bf16 inputs / bf16 MXU operands + approx reciprocal -> loose tolerance.
    np.testing.assert_allclose(np.asarray(out), np.asarray(ref), rtol=2e-2, atol=2e-2)
    print("KERNEL_OK")
</pallas_src>

<mosaic_0001>
module attributes {stable_mosaic.version = 11 : i64} {
  func.func @_spatial_attn_kernel(%arg0: i32, %arg1: memref<2x3x16x8xbf16, #tpu.memory_space<vmem>>, %arg2: memref<2x3x5x16xbf16, #tpu.memory_space<vmem>>, %arg3: memref<3x4x8x8xbf16, #tpu.memory_space<vmem>>, %arg4: memref<2x3x160xf32, #tpu.memory_space<vmem>>) attributes {dimension_semantics = [#tpu.dimension_semantics<arbitrary>], iteration_bounds = array<i64: 1>, scalar_prefetch = 0 : i64, scratch_operands = 0 : i64, tpu.core_type = #tpu.core_type<tc>, window_params = [{pipeline_mode = #tpu.pipeline_mode<synchronous>, transform_indices = @transform_0, window_bounds = array<i64: 2, 3, 16, 8>}, {pipeline_mode = #tpu.pipeline_mode<synchronous>, transform_indices = @transform_1, window_bounds = array<i64: 2, 3, 5, 16>}, {pipeline_mode = #tpu.pipeline_mode<synchronous>, transform_indices = @transform_2, window_bounds = array<i64: 3, 4, 8, 8>}, {pipeline_mode = #tpu.pipeline_mode<synchronous>, transform_indices = @transform_3, window_bounds = array<i64: 2, 3, 160>}]} {
    %c0 = arith.constant 0 : index
    %c0_0 = arith.constant 0 : index
    %c0_1 = arith.constant 0 : index
    %c0_2 = arith.constant 0 : index
    %0 = vector.load %arg1[%c0, %c0_0, %c0_1, %c0_2] : memref<2x3x16x8xbf16, #tpu.memory_space<vmem>>, vector<2x3x16x8xbf16>
    %c0_3 = arith.constant 0 : index
    %c0_4 = arith.constant 0 : index
    %c0_5 = arith.constant 0 : index
    %c0_6 = arith.constant 0 : index
    %1 = vector.load %arg2[%c0_3, %c0_4, %c0_5, %c0_6] : memref<2x3x5x16xbf16, #tpu.memory_space<vmem>>, vector<2x3x5x16xbf16>
    %c0_7 = arith.constant 0 : index
    %c0_8 = arith.constant 0 : index
    %c0_9 = arith.constant 0 : index
    %c0_10 = arith.constant 0 : index
    %2 = vector.load %arg3[%c0_7, %c0_8, %c0_9, %c0_10] : memref<3x4x8x8xbf16, #tpu.memory_space<vmem>>, vector<3x4x8x8xbf16>
    %3 = vector.shape_cast %0 : vector<2x3x16x8xbf16> to vector<96x8xbf16>
    %4 = vector.shape_cast %3 : vector<96x8xbf16> to vector<1x96x8xbf16>
    %5 = vector.shape_cast %4 : vector<1x96x8xbf16> to vector<1x96x8xbf16>
    %6 = vector.broadcast %5 : vector<1x96x8xbf16> to vector<4x96x8xbf16>
    %7 = vector.extract_strided_slice %2 {offsets = [0, 0, 0, 0], sizes = [1, 4, 8, 8], strides = [1, 1, 1, 1]} : vector<3x4x8x8xbf16> to vector<1x4x8x8xbf16>
    %8 = vector.shape_cast %7 : vector<1x4x8x8xbf16> to vector<4x8x8xbf16>
    "tpu.trace_start"() <{level = 10 : i32, message = "hnd,hde->hne"}> : () -> ()
    %cst = arith.constant dense<0.000000e+00> : vector<4x96x8xf32>
    %9 = tpu.matmul %6, %8, %cst {dimension_numbers = #tpu.dot_dimension_numbers<[2], [1], [1], [2], [0, 0, 0, 1, 1, 2], [0], [0]>} : vector<4x96x8xbf16>, vector<4x8x8xbf16>, vector<4x96x8xf32> -> vector<4x96x8xf32>
    "tpu.trace_stop"() : () -> ()
    %10 = vector.shape_cast %9 : vector<4x96x8xf32> to vector<24x16x8xf32>
    %11 = arith.truncf %10 : vector<24x16x8xf32> to vector<24x16x8xbf16>
    %12 = vector.extract_strided_slice %2 {offsets = [1, 0, 0, 0], sizes = [1, 4, 8, 8], strides = [1, 1, 1, 1]} : vector<3x4x8x8xbf16> to vector<1x4x8x8xbf16>
    %13 = vector.shape_cast %12 : vector<1x4x8x8xbf16> to vector<4x8x8xbf16>
    "tpu.trace_start"() <{level = 10 : i32, message = "hnd,hde->hne"}> : () -> ()
    %cst_11 = arith.constant dense<0.000000e+00> : vector<4x96x8xf32>
    %14 = tpu.matmul %6, %13, %cst_11 {dimension_numbers = #tpu.dot_dimension_numbers<[2], [1], [1], [2], [0, 0, 0, 1, 1, 2], [0], [0]>} : vector<4x96x8xbf16>, vector<4x8x8xbf16>, vector<4x96x8xf32> -> vector<4x96x8xf32>
    "tpu.trace_stop"() : () -> ()
    %15 = vector.shape_cast %14 : vector<4x96x8xf32> to vector<24x16x8xf32>
    %16 = arith.truncf %15 : vector<24x16x8xf32> to vector<24x16x8xbf16>
    %17 = vector.extract_strided_slice %2 {offsets = [2, 0, 0, 0], sizes = [1, 4, 8, 8], strides = [1, 1, 1, 1]} : vector<3x4x8x8xbf16> to vector<1x4x8x8xbf16>
    %18 = vector.shape_cast %17 : vector<1x4x8x8xbf16> to vector<4x8x8xbf16>
    "tpu.trace_start"() <{level = 10 : i32, message = "hnd,hde->hne"}> : () -> ()
    %cst_12 = arith.constant dense<0.000000e+00> : vector<4x96x8xf32>
    %19 = tpu.matmul %6, %18, %cst_12 {dimension_numbers = #tpu.dot_dimension_numbers<[2], [1], [1], [2], [0, 0, 0, 1, 1, 2], [0], [0]>} : vector<4x96x8xbf16>, vector<4x8x8xbf16>, vector<4x96x8xf32> -> vector<4x96x8xf32>
    "tpu.trace_stop"() : () -> ()
    %20 = vector.shape_cast %19 : vector<4x96x8xf32> to vector<24x16x8xf32>
    %21 = arith.truncf %20 : vector<24x16x8xf32> to vector<24x16x8xbf16>
    "tpu.trace_start"() <{level = 10 : i32, message = "bqd,bkd->bqk"}> : () -> ()
    %cst_13 = arith.constant dense<0.000000e+00> : vector<24x16x16xf32>
    %22 = tpu.matmul %11, %16, %cst_13 {dimension_numbers = #tpu.dot_dimension_numbers<[2], [2], [1], [1], [0, 0, 0, 1, 1, 1], [0], [0]>} : vector<24x16x8xbf16>, vector<24x16x8xbf16>, vector<24x16x16xf32> -> vector<24x16x16xf32>
    "tpu.trace_stop"() : () -> ()
    %cst_14 = arith.constant dense<0xFF800000> : vector<24x16xf32>
    %23 = vector.multi_reduction <maximumf>, %22, %cst_14 [2] : vector<24x16x16xf32> to vector<24x16xf32>
    %24 = vector.shape_cast %23 : vector<24x16xf32> to vector<24x16x1xf32>
    %25 = vector.broadcast %24 : vector<24x16x1xf32> to vector<24x16x16xf32>
    %26 = arith.subf %22, %25 : vector<24x16x16xf32>
    %27 = math.exp %26 : vector<24x16x16xf32>
    %cst_15 = arith.constant dense<0.000000e+00> : vector<24x16xf32>
    %28 = vector.multi_reduction <add>, %27, %cst_15 [2] : vector<24x16x16xf32> to vector<24x16xf32>
    %29 = vector.shape_cast %28 : vector<24x16xf32> to vector<24x16x1xf32>
    %30 = tpu.reciprocal %29 {approx = true} : vector<24x16x1xf32> -> vector<24x16x1xf32>
    %31 = vector.broadcast %30 : vector<24x16x1xf32> to vector<24x16x16xf32>
    %32 = arith.mulf %27, %31 : vector<24x16x16xf32>
    %33 = arith.truncf %32 : vector<24x16x16xf32> to vector<24x16x16xbf16>
    "tpu.trace_start"() <{level = 10 : i32, message = "bqk,bkd->bqd"}> : () -> ()
    %cst_16 = arith.constant dense<0.000000e+00> : vector<24x16x8xf32>
    %34 = tpu.matmul %33, %21, %cst_16 {dimension_numbers = #tpu.dot_dimension_numbers<[2], [1], [1], [2], [0, 0, 0, 1, 1, 2], [0], [0]>} : vector<24x16x16xbf16>, vector<24x16x8xbf16>, vector<24x16x8xf32> -> vector<24x16x8xf32>
    "tpu.trace_stop"() : () -> ()
    %35 = vector.shape_cast %1 : vector<2x3x5x16xbf16> to vector<6x5x16xbf16>
    %36 = vector.shape_cast %35 : vector<6x5x16xbf16> to vector<1x6x5x16xbf16>
    %37 = vector.shape_cast %36 : vector<1x6x5x16xbf16> to vector<1x6x5x16xbf16>
    %38 = vector.broadcast %37 : vector<1x6x5x16xbf16> to vector<4x6x5x16xbf16>
    %39 = vector.shape_cast %38 : vector<4x6x5x16xbf16> to vector<24x5x16xbf16>
    %40 = arith.extf %39 : vector<24x5x16xbf16> to vector<24x5x16xf32>
    "tpu.trace_start"() <{level = 10 : i32, message = "bmn,bnd->bmd"}> : () -> ()
    %cst_17 = arith.constant dense<0.000000e+00> : vector<24x5x8xf32>
    %41 = tpu.matmul %40, %34, %cst_17 {dimension_numbers = #tpu.dot_dimension_numbers<[2], [1], [1], [2], [0, 0, 0, 1, 1, 2], [0], [0]>} : vector<24x5x16xf32>, vector<24x16x8xf32>, vector<24x5x8xf32> -> vector<24x5x8xf32>
    "tpu.trace_stop"() : () -> ()
    %42 = vector.shape_cast %41 : vector<24x5x8xf32> to vector<4x6x5x8xf32>
    %43 = vector.extract_strided_slice %42 {offsets = [0, 0, 0, 0], sizes = [1, 6, 5, 8], strides = [1, 1, 1, 1]} : vector<4x6x5x8xf32> to vector<1x6x5x8xf32>
    %44 = vector.shape_cast %43 : vector<1x6x5x8xf32> to vector<6x5x8xf32>
    %45 = vector.extract_strided_slice %42 {offsets = [1, 0, 0, 0], sizes = [1, 6, 5, 8], strides = [1, 1, 1, 1]} : vector<4x6x5x8xf32> to vector<1x6x5x8xf32>
    %46 = vector.shape_cast %45 : vector<1x6x5x8xf32> to vector<6x5x8xf32>
    %47 = vector.extract_strided_slice %42 {offsets = [2, 0, 0, 0], sizes = [1, 6, 5, 8], strides = [1, 1, 1, 1]} : vector<4x6x5x8xf32> to vector<1x6x5x8xf32>
    %48 = vector.shape_cast %47 : vector<1x6x5x8xf32> to vector<6x5x8xf32>
    %49 = vector.extract_strided_slice %42 {offsets = [3, 0, 0, 0], sizes = [1, 6, 5, 8], strides = [1, 1, 1, 1]} : vector<4x6x5x8xf32> to vector<1x6x5x8xf32>
    %50 = vector.shape_cast %49 : vector<1x6x5x8xf32> to vector<6x5x8xf32>
    %51 = tpu.concatenate %44, %46, %48, %50 in 2 : vector<6x5x8xf32>, vector<6x5x8xf32>, vector<6x5x8xf32>, vector<6x5x8xf32> -> vector<6x5x32xf32>
    %52 = vector.shape_cast %51 : vector<6x5x32xf32> to vector<2x3x160xf32>
    %c0_18 = arith.constant 0 : index
    %c0_19 = arith.constant 0 : index
    %c0_20 = arith.constant 0 : index
    %53 = vector.load %arg4[%c0_18, %c0_19, %c0_20] : memref<2x3x160xf32, #tpu.memory_space<vmem>>, vector<2x3x160xf32>
    tpu.vector_store %arg4[%c0_18, %c0_19, %c0_20], %52 {strides = array<i32>} : memref<2x3x160xf32, #tpu.memory_space<vmem>>, vector<2x3x160xf32>,
    return
  }
  func.func @transform_0(%arg0: i32) -> (i32, i32, i32, i32) {
    %c0_i32 = arith.constant 0 : i32
    %c0_i32_0 = arith.constant 0 : i32
    %c0_i32_1 = arith.constant 0 : i32
    %c0_i32_2 = arith.constant 0 : i32
    %c0_i32_3 = arith.constant 0 : i32
    return %c0_i32, %c0_i32_0, %c0_i32_1, %c0_i32_2 : i32, i32, i32, i32
  }
  func.func @transform_1(%arg0: i32) -> (i32, i32, i32, i32) {
    %c0_i32 = arith.constant 0 : i32
    %c0_i32_0 = arith.constant 0 : i32
    %c0_i32_1 = arith.constant 0 : i32
    %c0_i32_2 = arith.constant 0 : i32
    %c0_i32_3 = arith.constant 0 : i32
    return %c0_i32, %c0_i32_0, %c0_i32_1, %c0_i32_2 : i32, i32, i32, i32
  }
  func.func @transform_2(%arg0: i32) -> (i32, i32, i32, i32) {
    %c0_i32 = arith.constant 0 : i32
    %c0_i32_0 = arith.constant 0 : i32
    %c0_i32_1 = arith.constant 0 : i32
    %c0_i32_2 = arith.constant 0 : i32
    %c0_i32_3 = arith.constant 0 : i32
    return %c0_i32, %c0_i32_0, %c0_i32_1, %c0_i32_2 : i32, i32, i32, i32
  }
  func.func @transform_3(%arg0: i32) -> (i32, i32, i32) {
    %c0_i32 = arith.constant 0 : i32
    %c0_i32_0 = arith.constant 0 : i32
    %c0_i32_1 = arith.constant 0 : i32
    %c0_i32_2 = arith.constant 0 : i32
    return %c0_i32, %c0_i32_0, %c0_i32_1 : i32, i32, i32
  }
}

</mosaic_0001>

<bundles_post_ra>
// kernel: tpu_custom_call.1
= control target key start
LH: loop header
LB: loop body
LE: loop exit
PB: predicated region body
PF: predicated region fallthrough
CT: control target
= control target key end

     0   :  { %vm94_vm0 = vcmask 1043456   ;;  %vm75_vm1 = vcmask 64512   ;;  %vm1463_vm2 = vcmask 130048   ;;  %s3815_s4 = smov 16   ;;  %s3816_s5 = smov 24   ;;  %vm3300_vm3 = vcmask 195584   ;;  %s5246_s2 = inlined_call_operand.vmem [shape: bf16[3,4,8,8], index: 2, kind: input, shape index: {}]   ;;  %s5247_s0 = inlined_call_operand.vmem [shape: bf16[2,3,16,8], index: 0, kind: input, shape index: {}]   ;;  %s5248_s1 = inlined_call_operand.vmem [shape: bf16[2,3,5,16], index: 1, kind: input, shape index: {}]   ;;  %s5249_s3 = inlined_call_operand.vmem [shape: f32[2,3,160], index: 3, kind: output, shape index: {}]  }
   0x1   :  { %v33_v0 = vld [vmem:[%s5246_s2] sm:$0xf]  ;;  %v34_v1 = vld [vmem:[%s5246_s2 + $0x4] sm:$0xf]  ;;  %v35_v2 = vld [vmem:[%s5246_s2 + $0x8] sm:$0xf] }
   0x2   :  { %v96_v3 = vsel %vm94_vm0, %v33_v0, 0  ;;  %v138_v4 = vsel %vm94_vm0, %v34_v1, 0  ;;  %v180_v5 = vsel %vm94_vm0, %v35_v2, 0  ;;  %v3857_v6 = vld [vmem:[%s5247_s0] sm:$0xff]  ;;  %v36_v7 = vld [vmem:[%s5246_s2 + $0xc] sm:$0xf] }
   0x3   :  { %105 = vmatpush.bf16.msra.mxu0 %v96_v3  ;;  %147 = vmatpush.bf16.msra.mxu1 %v138_v4  ;;  %v222_v8 = vsel %vm94_vm0, %v36_v7, 0  ;;  %v3874_v9 = vld [vmem:[%s5247_s0 + $0x8] sm:$0xff]  ;;  %v3887_v10 = vld [vmem:[%s5247_s0 + $0x10] sm:$0xff]  ;;  %v3900_v11 = vld [vmem:[%s5247_s0 + $0x18] sm:$0xff]  ;;  %vm3308_vm4 = vcmask 1047556   ;;  %s3819_s6 = smov 64  }
   0x4   :  { %189 = vmatpush.bf16.msra.mxu2 %v180_v5  ;;  %231 = vmatpush.bf16.msra.mxu3 %v222_v8  ;;  %v37_v12 = vld [vmem:[%s5246_s2 + $0x10] sm:$0xf]  ;;  %v38_v13 = vld [vmem:[%s5246_s2 + $0x14] sm:$0xf]  ;;  %v39_v14 = vld [vmem:[%s5246_s2 + $0x18] sm:$0xf] }
   0x5   :  { %v312_v15 = vsel %vm94_vm0, %v37_v12, 0  ;;  %v354_v16 = vsel %vm94_vm0, %v38_v13, 0  ;;  %v396_v17 = vsel %vm94_vm0, %v39_v14, 0  ;;  %v40_v18 = vld [vmem:[%s5246_s2 + $0x1c] sm:$0xf]  ;;  %v3929_v20 = vld [vmem:[%s5247_s0 + $0x20] sm:$0xff] }
   0x6   :  { %3464 = vmatmul.msk.bf16.vlgmr.msra.gmra.mxu0 %vm75_vm1, %v3857_v6  ;;  %3470 = vmatmul.msk.bf16.vlgmr.msra.gmra.mxu1 %vm75_vm1, %v3857_v6  ;;  %v438_v19 = vsel %vm94_vm0, %v40_v18, 0  ;;  %v3942_v21 = vld [vmem:[%s5247_s0 + $0x28] sm:$0xff]  ;;  %v41_v7 = vld [vmem:[%s5246_s2 + $0x20] sm:$0xf]  ;;  %v42_v8 = vld [vmem:[%s5246_s2 + $0x24] sm:$0xf] }
   0x7   :  { %3476 = vmatmul.msk.bf16.vlgmr.msra.gmra.mxu2 %vm75_vm1, %v3857_v6  ;;  %3482 = vmatmul.msk.bf16.vlgmr.msra.gmra.mxu3 %vm75_vm1, %v3857_v6  ;;  %v43_v12 = vld [vmem:[%s5246_s2 + $0x28] sm:$0xf]  ;;  %v570_v18 = vsel %vm94_vm0, %v42_v8, 0  ;;  %s3820_s7 = smov 32   ;;  %s3821_s8 = smov 96   ;;  %vm3412_vm5 = vcmask 261120  }
   0x8   :  { %321 = vmatpush.bf16.msrb.mxu0 %v312_v15  ;;  %363 = vmatpush.bf16.msrb.mxu1 %v354_v16  ;;  %vm3415_vm6 = vcmask 523264   ;;  %vm3431_vm7 = vcmask 1042432   ;;  %vm3432_vm8 = vcmask 260100   ;;  %vm3418_vm9 = vcmask 785408  }
   0x9   :  { %405 = vmatpush.bf16.msrb.mxu2 %v396_v17  ;;  %447 = vmatpush.bf16.msrb.mxu3 %v438_v19  ;;  %v528_v17 = vsel %vm94_vm0, %v41_v7, 0  ;;  %v44_v19 = vld [vmem:[%s5246_s2 + $0x2c] sm:$0xf]  ;;  %vm3433_vm10 = vmor %vm3432_vm8, %vm3431_vm7 }
   0xc   :  { %537 = vmatpush.bf16.msra.mxu0 %v528_v17  ;;  %579 = vmatpush.bf16.msra.mxu1 %v570_v18 }
  0x16   :  { %3465 = vmatmul.msk.bf16.gmra.mxu0 %vm75_vm1, %v3874_v9  ;;  %3471 = vmatmul.msk.bf16.gmra.mxu1 %vm75_vm1, %v3874_v9 }
  0x17   :  { %3477 = vmatmul.msk.bf16.gmra.mxu2 %vm75_vm1, %v3874_v9  ;;  %3483 = vmatmul.msk.bf16.gmra.mxu3 %vm75_vm1, %v3874_v9 }
  0x26   :  { %3466 = vmatmul.msk.bf16.gmra.mxu0 %vm75_vm1, %v3887_v10  ;;  %3472 = vmatmul.msk.bf16.gmra.mxu1 %vm75_vm1, %v3887_v10 }
  0x27   :  { %3478 = vmatmul.msk.bf16.gmra.mxu2 %vm75_vm1, %v3887_v10  ;;  %3484 = vmatmul.msk.bf16.gmra.mxu3 %vm75_vm1, %v3887_v10 }
  0x36   :  { %3467 = vmatmul.msk.bf16.gmra.mxu0 %vm75_vm1, %v3900_v11  ;;  %3473 = vmatmul.msk.bf16.gmra.mxu1 %vm75_vm1, %v3900_v11 }
  0x37   :  { %3479 = vmatmul.msk.bf16.gmra.mxu2 %vm75_vm1, %v3900_v11  ;;  %3485 = vmatmul.msk.bf16.gmra.mxu3 %vm75_vm1, %v3900_v11 }
  0x46   :  { %3468 = vmatmul.msk.bf16.gmra.mxu0 %vm75_vm1, %v3929_v20  ;;  %3474 = vmatmul.msk.bf16.gmra.mxu1 %vm75_vm1, %v3929_v20 }
  0x47   :  { %3480 = vmatmul.msk.bf16.gmra.mxu2 %vm75_vm1, %v3929_v20  ;;  %3486 = vmatmul.msk.bf16.gmra.mxu3 %vm75_vm1, %v3929_v20 }
  0x56   :  { %3469 = vmatmul.msk.bf16.gmra.mxu0 %vm75_vm1, %v3942_v21  ;;  %3475 = vmatmul.msk.bf16.gmra.mxu1 %vm75_vm1, %v3942_v21 }
  0x57   :  { %3481 = vmatmul.msk.bf16.gmra.mxu2 %vm75_vm1, %v3942_v21  ;;  %3487 = vmatmul.msk.bf16.gmra.mxu3 %vm75_vm1, %v3942_v21 }
  0x66   :  { %3488 = vmatmul.msk.bf16.vlgmr.msrb.gmra.mxu0 %vm75_vm1, %v3857_v6  ;;  %3494 = vmatmul.msk.bf16.vlgmr.msrb.gmra.mxu1 %vm75_vm1, %v3857_v6 }
  0x67   :  { %3500 = vmatmul.msk.bf16.vlgmr.msrb.gmra.mxu2 %vm75_vm1, %v3857_v6  ;;  %3506 = vmatmul.msk.bf16.vlgmr.msrb.gmra.mxu3 %vm75_vm1, %v3857_v6 }
  0x76   :  { %3489 = vmatmul.msk.bf16.gmra.mxu0 %vm75_vm1, %v3874_v9  ;;  %3495 = vmatmul.msk.bf16.gmra.mxu1 %vm75_vm1, %v3874_v9 }
  0x77   :  { %3501 = vmatmul.msk.bf16.gmra.mxu2 %vm75_vm1, %v3874_v9  ;;  %3507 = vmatmul.msk.bf16.gmra.mxu3 %vm75_vm1, %v3874_v9 }
  0x83   :  { %v107_v22 = vpop.f32.mrf.mxu0  ;;  %v149_v23 = vpop.f32.mrf.mxu1 }
  0x84   :  { %v275_v24 = vpack.c.bf16 %v149_v23, %v149_v23  ;;  %v263_v25 = vpack.c.bf16 %v107_v22, %v107_v22  ;;  %v612_v22 = vsel %vm94_vm0, %v43_v12, 0  ;;  %v654_v23 = vsel %vm94_vm0, %v44_v19, 0 }
  0x85   :  { %621 = vmatpush.bf16.msra.mxu2 %v612_v22  ;;  %663 = vmatpush.bf16.msra.mxu3 %v654_v23 }
  0x86   :  { %3490 = vmatmul.msk.bf16.gmra.mxu0 %vm75_vm1, %v3887_v10  ;;  %3496 = vmatmul.msk.bf16.gmra.mxu1 %vm75_vm1, %v3887_v10  ;;  %v3976_v30 = vunpack.c.l.b16 %v275_v24  ;;  %v3978_v33 = vunpack.c.l.b16 %v263_v25 }
  0x87   :  { %3502 = vmatmul.msk.bf16.gmra.mxu2 %vm75_vm1, %v3887_v10  ;;  %3508 = vmatmul.msk.bf16.gmra.mxu3 %vm75_vm1, %v3887_v10 }
  0x8a   :  { %v191_v26 = vpop.f32.mrf.mxu2  ;;  %v233_v27 = vpop.f32.mrf.mxu3 }
  0x8b   :  { %v109_v28 = vpop.f32.mrf.mxu0  ;;  %v151_v29 = vpop.f32.mrf.mxu1  ;;  %v287_v38 = vpack.c.bf16 %v191_v26, %v191_v26  ;;  %v299_v39 = vpack.c.bf16 %v233_v27, %v233_v27 }
  0x8c   :  { %v264_v31 = vpack.c.bf16 %v109_v28, %v109_v28  ;;  %v276_v32 = vpack.c.bf16 %v151_v29, %v151_v29 }
  0x8d   :  { %v3988_v46 = vunpack.c.l.b16 %v287_v38  ;;  %v3990_v47 = vunpack.c.l.b16 %v299_v39 }
  0x8e   :  { %v3980_v34 = vunpack.c.l.b16 %v264_v31  ;;  %v3982_v35 = vunpack.c.l.b16 %v276_v32 }
  0x8f   :  { %5274 = vst [vmem:[#allocation2_spill] sm:$0xff] %v3990_v47 }
  0x92   :  { %v193_v40 = vpop.f32.mrf.mxu2  ;;  %v235_v41 = vpop.f32.mrf.mxu3 }
  0x93   :  { %v288_v42 = vpack.c.bf16 %v193_v40, %v193_v40  ;;  %v112_v43 = vpop.f32.mrf.mxu0  ;;  %v154_v44 = vpop.f32.mrf.mxu1  ;;  %v300_v45 = vpack.c.bf16 %v235_v41, %v235_v41 }
  0x94   :  { %v277_v52 = vpack.c.bf16 %v154_v44, %v154_v44  ;;  %v265_v53 = vpack.c.bf16 %v112_v43, %v112_v43 }
  0x95   :  { %v3992_v48 = vunpack.c.l.b16 %v288_v42  ;;  %v3994_v49 = vunpack.c.l.b16 %v300_v45 }
  0x96   :  { %3491 = vmatmul.msk.bf16.gmra.mxu0 %vm75_vm1, %v3900_v11  ;;  %3497 = vmatmul.msk.bf16.gmra.mxu1 %vm75_vm1, %v3900_v11  ;;  %v4008_v58 = vunpack.c.l.b16 %v277_v52  ;;  %v4010_v61 = vunpack.c.l.b16 %v265_v53 }
  0x97   :  { %5275 = vst [vmem:[#allocation3_spill] sm:$0xff] %v3994_v49  ;;  %3503 = vmatmul.msk.bf16.gmra.mxu2 %vm75_vm1, %v3900_v11  ;;  %3509 = vmatmul.msk.bf16.gmra.mxu3 %vm75_vm1, %v3900_v11 }
  0x9a   :  { %v196_v54 = vpop.f32.mrf.mxu2  ;;  %v238_v55 = vpop.f32.mrf.mxu3 }
  0x9b   :  { %v114_v56 = vpop.f32.mrf.mxu0  ;;  %v156_v57 = vpop.f32.mrf.mxu1  ;;  %v289_v2 = vpack.c.bf16 %v196_v54, %v196_v54  ;;  %v301_v3 = vpack.c.bf16 %v238_v55, %v238_v55 }
  0x9c   :  { %v266_v59 = vpack.c.bf16 %v114_v56, %v114_v56  ;;  %v278_v60 = vpack.c.bf16 %v156_v57, %v156_v57 }
  0x9d   :  { %v4036_v24 = vunpack.c.l.b16 %v289_v2  ;;  %v4038_v25 = vunpack.c.l.b16 %v301_v3 }
  0x9e   :  { %v4012_v62 = vunpack.c.l.b16 %v266_v59  ;;  %v4014_v63 = vunpack.c.l.b16 %v278_v60 }
  0x9f   :  { %5276 = vst [vmem:[#allocation4_spill] sm:$0xff] %v4036_v24 }
  0xa0   :  { %5277 = vst [vmem:[#allocation5_spill] sm:$0xff] %v4038_v25 }
  0xa2   :  { %v198_v4 = vpop.f32.mrf.mxu2  ;;  %v240_v5 = vpop.f32.mrf.mxu3 }
  0xa3   :  { %v290_v13 = vpack.c.bf16 %v198_v4, %v198_v4  ;;  %v117_v14 = vpop.f32.mrf.mxu0  ;;  %v159_v15 = vpop.f32.mrf.mxu1  ;;  %v302_v16 = vpack.c.bf16 %v240_v5, %v240_v5 }
  0xa4   :  { %v279_v31 = vpack.c.bf16 %v159_v15, %v159_v15  ;;  %v267_v32 = vpack.c.bf16 %v117_v14, %v117_v14 }
  0xa5   :  { %v4040_v26 = vunpack.c.l.b16 %v290_v13  ;;  %v4042_v27 = vunpack.c.l.b16 %v302_v16 }
  0xa6   :  { %3492 = vmatmul.msk.bf16.gmra.mxu0 %vm75_vm1, %v3929_v20  ;;  %3498 = vmatmul.msk.bf16.gmra.mxu1 %vm75_vm1, %v3929_v20  ;;  %v4056_v42 = vunpack.c.l.b16 %v279_v31  ;;  %v4058_v45 = vunpack.c.l.b16 %v267_v32 }
  0xa7   :  { %5278 = vst [vmem:[#allocation6_spill] sm:$0xff] %v4040_v26  ;;  %3504 = vmatmul.msk.bf16.gmra.mxu2 %vm75_vm1, %v3929_v20  ;;  %3510 = vmatmul.msk.bf16.gmra.mxu3 %vm75_vm1, %v3929_v20 }
  0xa8   :  { %5279 = vst [vmem:[#allocation7_spill] sm:$0xff] %v4042_v27 }
  0xaa   :  { %v201_v38 = vpop.f32.mrf.mxu2  ;;  %v243_v39 = vpop.f32.mrf.mxu3 }
  0xab   :  { %v119_v40 = vpop.f32.mrf.mxu0  ;;  %v161_v41 = vpop.f32.mrf.mxu1  ;;  %v291_v56 = vpack.c.bf16 %v201_v38, %v201_v38  ;;  %v303_v57 = vpack.c.bf16 %v243_v39, %v243_v39 }
  0xac   :  { %v268_v43 = vpack.c.bf16 %v119_v40, %v119_v40  ;;  %v280_v44 = vpack.c.bf16 %v161_v41, %v161_v41 }
  0xad   :  { %v4068_v7 = vunpack.c.l.b16 %v291_v56  ;;  %v4070_v8 = vunpack.c.l.b16 %v303_v57 }
  0xae   :  { %v4060_v52 = vunpack.c.l.b16 %v268_v43  ;;  %v4062_v53 = vunpack.c.l.b16 %v280_v44 }
  0xaf   :  { %5280 = vst [vmem:[#allocation8_spill] sm:$0xff] %v4070_v8 }
  0xb2   :  { %v203_v59 = vpop.f32.mrf.mxu2  ;;  %v245_v60 = vpop.f32.mrf.mxu3 }
  0xb3   :  { %v292_v2 = vpack.c.bf16 %v203_v59, %v203_v59  ;;  %v122_v3 = vpop.f32.mrf.mxu0  ;;  %v164_v4 = vpop.f32.mrf.mxu1  ;;  %v304_v5 = vpack.c.bf16 %v245_v60, %v245_v60 }
  0xb4   :  { %v281_v16 = vpack.c.bf16 %v164_v4, %v164_v4  ;;  %v269_v17 = vpack.c.bf16 %v122_v3, %v122_v3 }
  0xb5   :  { %v4072_v12 = vunpack.c.l.b16 %v292_v2  ;;  %v4074_v13 = vunpack.c.l.b16 %v304_v5 }
  0xb6   :  { %3493 = vmatmul.msk.bf16.gmra.mxu0 %vm75_vm1, %v3942_v21  ;;  %3499 = vmatmul.msk.bf16.gmra.mxu1 %vm75_vm1, %v3942_v21  ;;  %v4088_v31 = vunpack.c.l.b16 %v281_v16  ;;  %v4090_v39 = vunpack.c.l.b16 %v269_v17 }
  0xb7   :  { %5281 = vst [vmem:[#allocation9_spill] sm:$0xff] %v4074_v13  ;;  %3505 = vmatmul.msk.bf16.gmra.mxu2 %vm75_vm1, %v3942_v21  ;;  %3511 = vmatmul.msk.bf16.gmra.mxu3 %vm75_vm1, %v3942_v21 }
  0xba   :  { %v206_v18 = vpop.f32.mrf.mxu2  ;;  %v248_v19 = vpop.f32.mrf.mxu3 }
  0xbb   :  { %v124_v22 = vpop.f32.mrf.mxu0  ;;  %v166_v23 = vpop.f32.mrf.mxu1  ;;  %v293_v56 = vpack.c.bf16 %v206_v18, %v206_v18  ;;  %v305_v57 = vpack.c.bf16 %v248_v19, %v248_v19 }
  0xbc   :  { %v270_v32 = vpack.c.bf16 %v124_v22, %v124_v22  ;;  %v282_v38 = vpack.c.bf16 %v166_v23, %v166_v23 }
  0xbd   :  { %v4100_v16 = vunpack.c.l.b16 %v293_v56  ;;  %v4102_v17 = vunpack.c.l.b16 %v305_v57 }
  0xbe   :  { %v4092_v40 = vunpack.c.l.b16 %v270_v32  ;;  %v4094_v41 = vunpack.c.l.b16 %v282_v38 }
  0xbf   :  { %5282 = vst [vmem:[#allocation10_spill] sm:$0xff] %v4102_v17 }
  0xc2   :  { %v208_v59 = vpop.f32.mrf.mxu2  ;;  %v250_v60 = vpop.f32.mrf.mxu3 }
  0xc3   :  { %v294_v2 = vpack.c.bf16 %v208_v59, %v208_v59  ;;  %v127_v3 = vpop.f32.mrf.mxu0  ;;  %v169_v4 = vpop.f32.mrf.mxu1  ;;  %v306_v5 = vpack.c.bf16 %v250_v60, %v250_v60 }
  0xc4   :  { %v283_v32 = vpack.c.bf16 %v169_v4, %v169_v4  ;;  %v271_v38 = vpack.c.bf16 %v127_v3, %v127_v3 }
  0xc5   :  { %v4104_v22 = vunpack.c.l.b16 %v294_v2  ;;  %v4106_v23 = vunpack.c.l.b16 %v306_v5 }
  0xc6   :  { %3512 = vmatmul.msk.bf16.vlgmr.msra.gmra.mxu0 %vm75_vm1, %v3857_v6  ;;  %3518 = vmatmul.msk.bf16.vlgmr.msra.gmra.mxu1 %vm75_vm1, %v3857_v6  ;;  %v4120_v2 = vunpack.c.l.b16 %v283_v32  ;;  %v4122_v29 = vunpack.c.l.b16 %v271_v38 }
  0xc7   :  { %5283 = vst [vmem:[#allocation11_spill] sm:$0xff] %v4106_v23  ;;  %3524 = vmatmul.msk.bf16.vlgmr.msra.gmra.mxu2 %vm75_vm1, %v3857_v6  ;;  %3530 = vmatmul.msk.bf16.vlgmr.msra.gmra.mxu3 %vm75_vm1, %v3857_v6 }
  0xca   :  { %v211_v56 = vpop.f32.mrf.mxu2  ;;  %v253_v57 = vpop.f32.mrf.mxu3 }
  0xcb   :  { %v129_v59 = vpop.f32.mrf.mxu0  ;;  %v171_v60 = vpop.f32.mrf.mxu1  ;;  %v295_v3 = vpack.c.bf16 %v211_v56, %v211_v56  ;;  %v307_v4 = vpack.c.bf16 %v253_v57, %v253_v57 }
  0xcc   :  { %v272_v5 = vpack.c.bf16 %v129_v59, %v129_v59  ;;  %v284_v15 = vpack.c.bf16 %v171_v60, %v171_v60 }
  0xcd   :  { %v4132_v38 = vunpack.c.l.b16 %v295_v3 }
  0xce   :  { %v4124_v28 = vunpack.c.l.b16 %v272_v5  ;;  %v4126_v19 = vunpack.c.l.b16 %v284_v15  ;;  %v4134_v5 = vunpack.c.l.b16 %v307_v4 }
  0xcf   :  { %5284 = vst [vmem:[#allocation12_spill] sm:$0xff] %v4132_v38 }
  0xd0   :  { %5285 = vst [vmem:[#allocation13_spill] sm:$0xff] %v4134_v5 }
  0xd2   :  { %v213_v18 = vpop.f32.mrf.mxu2  ;;  %v255_v50 = vpop.f32.mrf.mxu3 }
  0xd3   :  { %v296_v32 = vpack.c.bf16 %v213_v18, %v213_v18  ;;  %v132_v44 = vpop.f32.mrf.mxu0  ;;  %v174_v59 = vpop.f32.mrf.mxu1  ;;  %v308_v60 = vpack.c.bf16 %v255_v50, %v255_v50 }
  0xd4   :  { %v285_v56 = vpack.c.bf16 %v174_v59, %v174_v59  ;;  %v273_v57 = vpack.c.bf16 %v132_v44, %v132_v44 }
  0xd5   :  { %v4136_v15 = vunpack.c.l.b16 %v296_v32  ;;  %v4138_v14 = vunpack.c.l.b16 %v308_v60 }
  0xd6   :  { %3513 = vmatmul.msk.bf16.gmra.mxu0 %vm75_vm1, %v3874_v9  ;;  %3519 = vmatmul.msk.bf16.gmra.mxu1 %vm75_vm1, %v3874_v9  ;;  %v4152_v55 = vunpack.c.l.b16 %v285_v56  ;;  %v4154_v18 = vunpack.c.l.b16 %v273_v57 }
  0xd7   :  { %5286 = vst [vmem:[#allocation14_spill] sm:$0xff] %v4136_v15  ;;  %3525 = vmatmul.msk.bf16.gmra.mxu2 %vm75_vm1, %v3874_v9  ;;  %3531 = vmatmul.msk.bf16.gmra.mxu3 %vm75_vm1, %v3874_v9 }
  0xd8   :  { %5287 = vst [vmem:[#allocation15_spill] sm:$0xff] %v4138_v14 }
  0xda   :  { %v216_v3 = vpop.f32.mrf.mxu2  ;;  %v258_v4 = vpop.f32.mrf.mxu3 }
  0xdb   :  { %v134_v32 = vpop.f32.mrf.mxu0  ;;  %v176_v60 = vpop.f32.mrf.mxu1  ;;  %v297_v44 = vpack.c.bf16 %v216_v3, %v216_v3  ;;  %v309_v59 = vpack.c.bf16 %v258_v4, %v258_v4 }
  0xdc   :  { %v274_v6 = vpack.c.bf16 %v134_v32, %v134_v32  ;;  %v286_v1 = vpack.c.bf16 %v176_v60, %v176_v60 }
  0xdd   :  { %v4166_v60 = vunpack.c.l.b16 %v297_v44 }
  0xde   :  { %v4156_v51 = vunpack.c.l.b16 %v274_v6  ;;  %v4158_v50 = vunpack.c.l.b16 %v286_v1  ;;  %v4168_v6 = vunpack.c.l.b16 %v309_v59 }
  0xdf   :  { %5288 = vst [vmem:[#allocation16_spill] sm:$0xff] %v4166_v60 }
  0xe0   :  { %5289 = vst [vmem:[#allocation17_spill] sm:$0xff] %v4168_v6 }
  0xe2   :  { %v218_v43 = vpop.f32.mrf.mxu2  ;;  %v260_v54 = vpop.f32.mrf.mxu3 }
  0xe3   :  { %v298_v56 = vpack.c.bf16 %v218_v43, %v218_v43  ;;  %v323_v0 = vpop.f32.mrf.mxu0  ;;  %v4164_v32 = vpop.f32.mrf.mxu1  ;;  %v310_v57 = vpack.c.bf16 %v260_v54, %v260_v54 }
  0xe4   :  { %v479_v3 = vpack.c.bf16 %v323_v0, %v323_v0 }
  0xe5   :  { %v4170_v1 = vunpack.c.l.b16 %v298_v56  ;;  %v4172_v36 = vunpack.c.l.b16 %v310_v57 }
  0xe6   :  { %3514 = vmatmul.msk.bf16.gmra.mxu0 %vm75_vm1, %v3887_v10  ;;  %3520 = vmatmul.msk.bf16.gmra.mxu1 %vm75_vm1, %v3887_v10  ;;  %v750_v9 = vunpack.c.l.b16 %v479_v3 }
  0xe7   :  { %5290 = vst [vmem:[#allocation18_spill] sm:$0xff] %v4170_v1  ;;  %3526 = vmatmul.msk.bf16.gmra.mxu2 %vm75_vm1, %v3887_v10  ;;  %3532 = vmatmul.msk.bf16.gmra.mxu3 %vm75_vm1, %v3887_v10 }
  0xe8   :  { %5291 = vst [vmem:[#allocation19_spill] sm:$0xff] %v4172_v36 }
  0xea   :  { %v407_v4 = vpop.f32.mrf.mxu2  ;;  %v449_v44 = vpop.f32.mrf.mxu3 }
  0xeb   :  { %v325_v59 = vpop.f32.mrf.mxu0  ;;  %v367_v56 = vpop.f32.mrf.mxu1  ;;  %v503_v23 = vpack.c.bf16 %v407_v4, %v407_v4  ;;  %v515_v43 = vpack.c.bf16 %v449_v44, %v449_v44 }
  0xec   :  { %v480_v57 = vpack.c.bf16 %v325_v59, %v325_v59 }
  0xed   :  { %v4189_v0 = vunpack.c.l.b16 %v503_v23  ;;  %v4191_v1 = vunpack.c.l.b16 %v515_v43 }
  0xee   :  { %v751_v37 = vunpack.c.l.b16 %v480_v57 }
  0xf0   :  { %v752_v17 = vpack.c.b16 %v751_v37, %v750_v9 }
  0xf2   :  { %v409_v8 = vpop.f32.mrf.mxu2  ;;  %v757_v54 = vsel %vm75_vm1, %v752_v17, 0  ;;  %v451_v6 = vpop.f32.mrf.mxu3 }
  0xf3   :  { %v504_v36 = vpack.c.bf16 %v409_v8, %v409_v8  ;;  %v328_v13 = vpop.f32.mrf.mxu0  ;;  %v4187_v60 = vpop.f32.mrf.mxu1  ;;  %766 = vmatpush.bf16.xpose.msrb.mxu0 %v757_v54  ;;  %v516_v10 = vpack.c.bf16 %v451_v6, %v451_v6 }
  0xf5   :  { %v4193_v59 = vunpack.c.l.b16 %v504_v36  ;;  %v4195_v3 = vunpack.c.l.b16 %v516_v10  ;;  %v481_v36 = vpack.c.bf16 %v328_v13, %v328_v13 }
  0xf6   :  { %3515 = vmatmul.msk.bf16.gmra.mxu0 %vm75_vm1, %v3900_v11  ;;  %3521 = vmatmul.msk.bf16.gmra.mxu1 %vm75_vm1, %v3900_v11 }
  0xf7   :  { %3527 = vmatmul.msk.bf16.gmra.mxu2 %vm75_vm1, %v3900_v11  ;;  %3533 = vmatmul.msk.bf16.gmra.mxu3 %vm75_vm1, %v3900_v11  ;;  %v780_v54 = vunpack.c.l.b16 %v481_v36  ;;  %v491_v36 = vpack.c.bf16 %v4164_v32, %v4164_v32 }
  0xfa   :  { %v412_v17 = vpop.f32.mrf.mxu2  ;;  %v4209_v23 = vpop.f32.mrf.mxu3 }
  0xfb   :  { %v330_v9 = vpop.f32.mrf.mxu0  ;;  %v372_v6 = vpop.f32.mrf.mxu1  ;;  %v505_v57 = vpack.c.bf16 %v412_v17, %v412_v17  ;;  %v492_v17 = vpack.c.bf16 %v367_v56, %v367_v56 }
  0xfc   :  { %v482_v43 = vpack.c.bf16 %v330_v9, %v330_v9 }
  0xfd   :  { %v4216_v11 = vunpack.c.l.b16 %v505_v57 }
  0xfe   :  { %v781_v4 = vunpack.c.l.b16 %v482_v43 }
 0x100   :  { %v782_v44 = vpack.c.b16 %v781_v4, %v780_v54  ;;  %v930_v54 = vunpack.c.l.b16 %v491_v36  ;;  %v931_v4 = vunpack.c.l.b16 %v492_v17  ;;  %v493_v36 = vpack.c.bf16 %v4187_v60, %v4187_v60 }
 0x101   :  { %v494_v17 = vpack.c.bf16 %v372_v6, %v372_v6 }
 0x102   :  { %v414_v10 = vpop.f32.mrf.mxu2  ;;  %v787_v8 = vsel %vm75_vm1, %v782_v44, 0  ;;  %v4212_v37 = vpop.f32.mrf.mxu3  ;;  %v932_v27 = vpack.c.b16 %v931_v4, %v930_v54 }
 0x103   :  { %v506_v5 = vpack.c.bf16 %v414_v10, %v414_v10  ;;  %v333_v14 = vpop.f32.mrf.mxu0  ;;  %v4214_v25 = vpop.f32.mrf.mxu1  ;;  %796 = vmatpush.bf16.xpose.msrb.mxu1 %v787_v8 }
 0x104   :  { %v937_v26 = vsel %vm75_vm1, %v932_v27, 0  ;;  %v960_v27 = vunpack.c.l.b16 %v493_v36  ;;  %v5293_v36 = vpack.c.b16 %v3980_v34, %v3978_v33  ;;  %v5296_v33 = vpack.c.b16 %v4092_v40, %v4090_v39 }
 0x105   :  { %v4218_v13 = vunpack.c.l.b16 %v506_v5  ;;  %v483_v5 = vpack.c.bf16 %v333_v14, %v333_v14 }
 0x106   :  { %3516 = vmatmul.msk.bf16.gmra.mxu0 %vm75_vm1, %v3929_v20  ;;  %3522 = vmatmul.msk.bf16.gmra.mxu1 %vm75_vm1, %v3929_v20 }
 0x107   :  { %3528 = vmatmul.msk.bf16.gmra.mxu2 %vm75_vm1, %v3929_v20  ;;  %3534 = vmatmul.msk.bf16.gmra.mxu3 %vm75_vm1, %v3929_v20  ;;  %v810_v56 = vunpack.c.l.b16 %v483_v5  ;;  %v961_v5 = vunpack.c.l.b16 %v494_v17  ;;  %v5294_v17 = vpack.c.b16 %v4012_v62, %v4010_v61 }
 0x109   :  { %v962_v6 = vpack.c.b16 %v961_v5, %v960_v27 }
 0x10a   :  { %v4232_v8 = vpop.f32.mrf.mxu2  ;;  %v4234_v43 = vpop.f32.mrf.mxu3 }
 0x10b   :  { %v335_v44 = vpop.f32.mrf.mxu0  ;;  %v377_v57 = vpop.f32.mrf.mxu1 }
 0x10c   :  { %v484_v32 = vpack.c.bf16 %v335_v44, %v335_v44  ;;  %v496_v27 = vpack.c.bf16 %v377_v57, %v377_v57 }
 0x10e   :  { %v811_v10 = vunpack.c.l.b16 %v484_v32  ;;  %v991_v62 = vunpack.c.l.b16 %v496_v27 }
 0x110   :  { %v812_v9 = vpack.c.b16 %v811_v10, %v810_v56 }
 0x112   :  { %v419_v38 = vpop.f32.mrf.mxu2  ;;  %v817_v15 = vsel %vm75_vm1, %v812_v9, 0  ;;  %v4237_v24 = vpop.f32.mrf.mxu3 }
 0x113   :  { %v338_v20 = vpop.f32.mrf.mxu0  ;;  %v4239_v14 = vpop.f32.mrf.mxu1  ;;  %826 = vmatpush.bf16.xpose.msrb.mxu2 %v817_v15 }
 0x114   :  { %v485_v15 = vpack.c.bf16 %v338_v20, %v338_v20 }
 0x116   :  { %3517 = vmatmul.msk.bf16.gmra.mxu0 %vm75_vm1, %v3942_v21  ;;  %3523 = vmatmul.msk.bf16.gmra.mxu1 %vm75_vm1, %v3942_v21  ;;  %v840_v32 = vunpack.c.l.b16 %v485_v15  ;;  %v495_v15 = vpack.c.bf16 %v4214_v25, %v4214_v25  ;;  %v508_v25 = vpack.c.bf16 %v419_v38, %v419_v38 }
 0x117   :  { %3529 = vmatmul.msk.bf16.gmra.mxu2 %vm75_vm1, %v3942_v21  ;;  %3535 = vmatmul.msk.bf16.gmra.mxu3 %vm75_vm1, %v3942_v21 }
 0x118   :  { %v990_v61 = vunpack.c.l.b16 %v495_v15  ;;  %v1171_v39 = vunpack.c.l.b16 %v508_v25  ;;  %v5297_v25 = vpack.c.b16 %v3982_v35, %v3976_v30  ;;  %v5299_v30 = vpack.c.b16 %v4014_v63, %v4008_v58 }
 0x11a   :  { %v4252_v9 = vpop.f32.mrf.mxu2 }
 0x11b   :  { %946 = vmatpush.bf16.xpose.msra.mxu2 %v937_v26  ;;  %v4254_v26 = vpop.f32.mrf.mxu3  ;;  %v340_v54 = vpop.f32.mrf.mxu0 }
 0x11c   :  { %5292 = vst [vmem:[#allocation20_spill] sm:$0xff] %v4254_v26  ;;  %v4256_v4 = vpop.f32.mrf.mxu1  ;;  %v486_v44 = vpack.c.bf16 %v340_v54, %v340_v54  ;;  %v967_v26 = vsel %vm75_vm1, %v962_v6, 0 }
 0x11e   :  { %v841_v60 = vunpack.c.l.b16 %v486_v44 }
 0x120   :  { %v842_v56 = vpack.c.b16 %v841_v60, %v840_v32  ;;  %v507_v60 = vpack.c.bf16 %v4232_v8, %v4232_v8 }
 0x122   :  { %v424_v10 = vpop.f32.mrf.mxu2  ;;  %v847_v47 = vsel %vm75_vm1, %v842_v56, 0 }
 0x123   :  { %v4259_v49 = vpop.f32.mrf.mxu3  ;;  %v343_v21 = vpop.f32.mrf.mxu0  ;;  %856 = vmatpush.bf16.xpose.msrb.mxu3 %v847_v47  ;;  %v5295_v47 = vpack.c.b16 %v4060_v52, %v4058_v45 }
 0x124   :  { %v385_v20 = vpop.f32.mrf.mxu1  ;;  %v487_v5 = vpack.c.bf16 %v343_v21, %v343_v21 }
 0x126   :  { %3536 = vmatmul.msk.bf16.vlgmr.msrb.gmra.mxu0 %vm75_vm1, %v5293_v36  ;;  %3537 = vmatmul.msk.bf16.vlgmr.msrb.gmra.mxu1 %vm75_vm1, %v5294_v17  ;;  %v870_v6 = vunpack.c.l.b16 %v487_v5  ;;  %v1170_v17 = vunpack.c.l.b16 %v507_v60  ;;  %v497_v5 = vpack.c.bf16 %v4239_v14, %v4239_v14  ;;  %v5298_v14 = vpack.c.b16 %v4124_v28, %v4122_v29 }
 0x127   :  { %3538 = vmatmul.msk.bf16.vlgmr.msrb.gmra.mxu2 %vm75_vm1, %v5295_v47 }
 0x12a   :  { %v4276_v54 = vpop.f32.mrf.mxu2  ;;  %3539 = vmatmul.msk.bf16.vlgmr.msrb.gmra.mxu3 %vm75_vm1, %v5296_v33 }
 0x12b   :  { %976 = vmatpush.bf16.xpose.msra.mxu3 %v967_v26  ;;  %v499_v26 = vpack.c.bf16 %v385_v20, %v385_v20  ;;  %v4282_v34 = vpop.f32.mrf.mxu3  ;;  %v345_v57 = vpop.f32.mrf.mxu0  ;;  %v992_v20 = vpack.c.b16 %v991_v62, %v990_v61  ;;  %v498_v61 = vpack.c.bf16 %v4256_v4, %v4256_v4  ;;  %v510_v62 = vpack.c.bf16 %v424_v10, %v424_v10 }
 0x12c   :  { %v387_v44 = vpop.f32.mrf.mxu1  ;;  %v488_v45 = vpack.c.bf16 %v345_v57, %v345_v57  ;;  %v5300_v4 = vpack.c.b16 %v4193_v59, %v4189_v0  ;;  %v1020_v10 = vunpack.c.l.b16 %v497_v5 }
 0x12d   :  { %v1050_v32 = vunpack.c.l.b16 %v499_v26  ;;  %v500_v52 = vpack.c.bf16 %v387_v44, %v387_v44  ;;  %v1172_v26 = vpack.c.b16 %v1171_v39, %v1170_v17  ;;  %v997_v8 = vsel %vm75_vm1, %v992_v20, 0 }
 0x12e   :  { %v871_v56 = vunpack.c.l.b16 %v488_v45  ;;  %v509_v45 = vpack.c.bf16 %v4252_v9, %v4252_v9  ;;  %v1117_v9 = vsel %vm75_vm1, %v5300_v4, 0  ;;  %v518_v17 = vpack.c.bf16 %v4212_v37, %v4212_v37 }
 0x12f   :  { %v1051_v21 = vunpack.c.l.b16 %v500_v52  ;;  %v1177_v44 = vsel %vm75_vm1, %v1172_v26, 0  ;;  %v5302_v4 = vpack.c.b16 %v4195_v3, %v4191_v1 }
 0x130   :  { %v872_v40 = vpack.c.b16 %v871_v56, %v870_v6  ;;  %v1021_v6 = vunpack.c.l.b16 %v498_v61  ;;  %v1201_v56 = vunpack.c.l.b16 %v510_v62 }
 0x131   :  { %v1052_v36 = vpack.c.b16 %v1051_v21, %v1050_v32 }
 0x132   :  { %v429_v47 = vpop.f32.mrf.mxu2  ;;  %v877_v15 = vsel %vm75_vm1, %v872_v40, 0  ;;  %v1200_v40 = vunpack.c.l.b16 %v509_v45 }
 0x133   :  { %v4287_v38 = vpop.f32.mrf.mxu3  ;;  %v1057_v27 = vsel %vm75_vm1, %v1052_v36, 0  ;;  %v348_v33 = vpop.f32.mrf.mxu0  ;;  %886 = vmatpush.bf16.xpose.msra.mxu0 %v877_v15  ;;  %v1022_v15 = vpack.c.b16 %v1021_v6, %v1020_v10  ;;  %v512_v59 = vpack.c.bf16 %v429_v47, %v429_v47  ;;  %v5304_v6 = vpack.c.b16 %v4156_v51, %v4154_v18 }
 0x134   :  { %v390_v57 = vpop.f32.mrf.mxu1  ;;  %1066 = vmatpush.bf16.xpose.msrb.mxu2 %v1057_v27  ;;  %v489_v52 = vpack.c.bf16 %v348_v33, %v348_v33  ;;  %v1202_v0 = vpack.c.b16 %v1201_v56, %v1200_v40  ;;  %v517_v33 = vpack.c.bf16 %v4209_v23, %v4209_v23  ;;  %v5305_v56 = vpack.c.b16 %v4062_v53, %v4056_v42 }
 0x135   :  { %v501_v32 = vpack.c.bf16 %v390_v57, %v390_v57  ;;  %v511_v57 = vpack.c.bf16 %v4276_v54, %v4276_v54  ;;  %v1027_v47 = vsel %vm75_vm1, %v1022_v15, 0  ;;  %v524_v3 = vpack.c.bf16 %v4287_v38, %v4287_v38 }
 0x136   :  { %v900_v58 = vunpack.c.l.b16 %v489_v52  ;;  %v1207_v23 = vsel %vm75_vm1, %v1202_v0, 0  ;;  %v1320_v54 = vunpack.c.l.b16 %v517_v33  ;;  %v5308_v51 = vpack.c.b16 %v4158_v50, %v4152_v55 }
 0x137   :  { %3542 = vmatmul.msk.bf16.vlgmr.msra.gmra.mxu2 %vm75_vm1, %v5297_v25  ;;  %v1080_v28 = vunpack.c.l.b16 %v501_v32  ;;  %v1321_v25 = vunpack.c.l.b16 %v518_v17  ;;  %v1230_v45 = vunpack.c.l.b16 %v511_v57  ;;  %v1411_v38 = vunpack.c.l.b16 %v524_v3  ;;  %v5324_v3 = vld [vmem:[#allocation6_spill] sm:$0xff] }
 0x139   :  { %v1322_v52 = vpack.c.b16 %v1321_v25, %v1320_v54 }
 0x13a   :  { %v4302_v60 = vpop.f32.mrf.mxu2  ;;  %3540 = vmatmul.msk.bf16.vlgmr.msra.gmra.mxu0 %vm75_vm1, %v5298_v14  ;;  %3543 = vmatmul.msk.bf16.vlgmr.msra.gmra.mxu3 %vm75_vm1, %v5299_v30  ;;  %v5301_v30 = vpack.c.b16 %v4126_v19, %v4120_v2  ;;  %v5307_v2 = vpack.c.b16 %v4218_v13, %v4216_v11  ;;  %v523_v11 = vpack.c.bf16 %v4282_v34, %v4282_v34 }
 0x13b   :  { %1006 = vmatpush.bf16.xpose.msrb.mxu0 %v997_v8  ;;  %v4312_v35 = vpop.f32.mrf.mxu3  ;;  %v350_v21 = vpop.f32.mrf.mxu0  ;;  %v1327_v42 = vsel %vm75_vm1, %v1322_v52, 0  ;;  %v520_v13 = vpack.c.bf16 %v4237_v24, %v4237_v24 }
 0x13c   :  { %1186 = vmatpush.bf16.xpose.msra.mxu2 %v1177_v44  ;;  %v392_v20 = vpop.f32.mrf.mxu1  ;;  %v490_v29 = vpack.c.bf16 %v350_v21, %v350_v21  ;;  %v1231_v44 = vunpack.c.l.b16 %v512_v59  ;;  %v1147_v1 = vsel %vm75_vm1, %v5307_v2, 0 }
 0x13d   :  { %v502_v39 = vpack.c.bf16 %v392_v20, %v392_v20  ;;  %v519_v20 = vpack.c.bf16 %v4234_v43, %v4234_v43  ;;  %v1351_v40 = vunpack.c.l.b16 %v520_v13 }
 0x13e   :  { %v901_v63 = vunpack.c.l.b16 %v490_v29  ;;  %v1232_v14 = vpack.c.b16 %v1231_v44, %v1230_v45  ;;  %v513_v29 = vpack.c.bf16 %v4302_v60, %v4302_v60 }
 0x13f   :  { %v1081_v36 = vunpack.c.l.b16 %v502_v39  ;;  %v525_v39 = vpack.c.bf16 %v4312_v35, %v4312_v35  ;;  %v1350_v43 = vunpack.c.l.b16 %v519_v20  ;;  %v5311_v35 = vpack.c.b16 %v4072_v12, %v4068_v7 }
 0x140   :  { %v902_v27 = vpack.c.b16 %v901_v63, %v900_v58  ;;  %v1237_v53 = vsel %vm75_vm1, %v1232_v14, 0  ;;  %v1260_v0 = vunpack.c.l.b16 %v513_v29  ;;  %v5316_v12 = vpack.c.b16 %v4104_v22, %v4100_v16 }
 0x141   :  { %v1082_v26 = vpack.c.b16 %v1081_v36, %v1080_v28  ;;  %v1410_v28 = vunpack.c.l.b16 %v523_v11  ;;  %v1440_v59 = vunpack.c.l.b16 %v525_v39 }
 0x142   :  { %v434_v8 = vpop.f32.mrf.mxu2  ;;  %v907_v5 = vsel %vm75_vm1, %v902_v27, 0  ;;  %v1352_v27 = vpack.c.b16 %v1351_v40, %v1350_v43 }
 0x143   :  { %1126 = vmatpush.bf16.xpose.msra.mxu0 %v1117_v9  ;;  %v1087_v61 = vsel %vm75_vm1, %v1082_v26, 0  ;;  %v476_v62 = vpop.f32.mrf.mxu3  ;;  %v4326_v37 = vpop.f32.mrf.mxu0  ;;  %916 = vmatpush.bf16.xpose.msra.mxu1 %v907_v5  ;;  %v1297_v9 = vsel %vm75_vm1, %v5302_v4, 0  ;;  %v514_v55 = vpack.c.bf16 %v434_v8, %v434_v8  ;;  %v1412_v63 = vpack.c.b16 %v1411_v38, %v1410_v28 }
 0x144   :  { %v4328_v32 = vpop.f32.mrf.mxu1  ;;  %1096 = vmatpush.bf16.xpose.msrb.mxu3 %v1087_v61  ;;  %v526_v50 = vpack.c.bf16 %v476_v62, %v476_v62  ;;  %v5313_v8 = vpack.c.b16 %v4094_v41, %v4088_v31  ;;  %v5314_v5 = vpack.c.b16 %v3992_v48, %v3988_v46  ;;  %v1357_v7 = vsel %vm75_vm1, %v1352_v27, 0  ;;  %v5317_v48 = vld [vmem:[#allocation20_spill] sm:$0xff] }
 0x145   :  { %v1261_v24 = vunpack.c.l.b16 %v514_v55  ;;  %v1417_v33 = vsel %vm75_vm1, %v1412_v63, 0  ;;  %v522_v46 = vpack.c.bf16 %v4259_v49, %v4259_v49  ;;  %v521_v44 = vpack.c.bf16 %v5317_v48, %v5317_v48  ;;  %v5320_v49 = vld [vmem:[#allocation3_spill] sm:$0xff] }
 0x146   :  { %v1441_v36 = vunpack.c.l.b16 %v526_v50  ;;  %v695_v16 = vpack.c.bf16 %v4326_v37, %v4326_v37  ;;  %v5331_v55 = vld [vmem:[#allocation7_spill] sm:$0xff]  ;;  %v5332_v50 = vld [vmem:[#allocation5_spill] sm:$0xff]  ;;  %v707_v63 = vpack.c.bf16 %v4328_v32, %v4328_v32 }
 0x147   :  { %3546 = vmatmul.msk.bf16.vlgmr.msrb.gmra.mxu2 %vm75_vm1, %v5301_v30  ;;  %v1262_v60 = vpack.c.b16 %v1261_v24, %v1260_v0  ;;  %v1380_v14 = vunpack.c.l.b16 %v521_v44  ;;  %v5333_v20 = vpack.c.b16 %v5331_v55, %v5332_v50  ;;  %v5340_v44 = vld [vmem:[#allocation18_spill] sm:$0xff] }
 0x148   :  { %1306 = vmatpush.bf16.xpose.msrb.mxu2 %v1297_v9  ;;  %v1442_v26 = vpack.c.b16 %v1441_v36, %v1440_v59  ;;  %v2047_v4 = vunpack.c.l.b16 %v695_v16  ;;  %v2215_v27 = vunpack.c.l.b16 %v707_v63 }
 0x149   :  { %v1267_v31 = vsel %vm75_vm1, %v1262_v60, 0 }
 0x14a   :  { %v4340_v10 = vpop.f32.mrf.mxu2  ;;  %3541 = vmatmul.msk.bf16.vlgmr.msra.gmra.mxu1 %vm75_vm1, %v5304_v6  ;;  %3544 = vmatmul.msk.bf16.vlgmr.msrb.gmra.mxu0 %vm75_vm1, %v5305_v56  ;;  %v1447_v41 = vsel %vm75_vm1, %v1442_v26, 0  ;;  %v5321_v6 = vld [vmem:[#allocation2_spill] sm:$0xff] }
 0x14b   :  { %1036 = vmatpush.bf16.xpose.msrb.mxu1 %v1027_v47  ;;  %5303 = vst [vmem:[#allocation21_spill] sm:$0xff] %v4340_v10  ;;  %v4350_v19 = vpop.f32.mrf.mxu3  ;;  %3547 = vmatmul.msk.bf16.vlgmr.msrb.gmra.mxu3 %vm75_vm1, %v5308_v51  ;;  %v541_v18 = vpop.f32.mrf.mxu0  ;;  %v1381_v47 = vunpack.c.l.b16 %v522_v46  ;;  %v5322_v56 = vpack.c.b16 %v5320_v49, %v5321_v6  ;;  %v5325_v51 = vld [vmem:[#allocation4_spill] sm:$0xff] }
 0x14c   :  { %1216 = vmatpush.bf16.xpose.msra.mxu3 %v1207_v23  ;;  %5306 = vst [vmem:[#allocation22_spill] sm:$0xff] %v4350_v19  ;;  %v4362_v21 = vpop.f32.mrf.mxu1  ;;  %1246 = vmatpush.bf16.xpose.msrb.mxu0 %v1237_v53  ;;  %v696_v22 = vpack.c.bf16 %v541_v18, %v541_v18  ;;  %v5326_v18 = vpack.c.b16 %v5324_v3, %v5325_v51  ;;  %v5328_v53 = vld [vmem:[#allocation12_spill] sm:$0xff] }
 0x14d   :  { %v1382_v30 = vpack.c.b16 %v1381_v47, %v1380_v14  ;;  %v708_v24 = vpack.c.bf16 %v4362_v21, %v4362_v21  ;;  %v5336_v21 = vld [vmem:[#allocation15_spill] sm:$0xff]  ;;  %v5341_v47 = vld [vmem:[#allocation16_spill] sm:$0xff] }
 0x14e   :  { %v2048_v9 = vunpack.c.l.b16 %v696_v22  ;;  %v5342_v16 = vpack.c.b16 %v5340_v44, %v5341_v47  ;;  %v5343_v22 = vld [vmem:[#allocation9_spill] sm:$0xff] }
 0x14f   :  { %v1387_v38 = vsel %vm75_vm1, %v1382_v30, 0  ;;  %v2216_v60 = vunpack.c.l.b16 %v708_v24 }
 0x152   :  { %v4376_v58 = vpop.f32.mrf.mxu2 }
 0x153   :  { %1156 = vmatpush.bf16.xpose.msra.mxu1 %v1147_v1  ;;  %5309 = vst [vmem:[#allocation23_spill] sm:$0xff] %v4376_v58  ;;  %v4378_v34 = vpop.f32.mrf.mxu3  ;;  %v4380_v17 = vpop.f32.mrf.mxu0  ;;  %v2049_v1 = vpack.c.b16 %v2048_v9, %v2047_v4  ;;  %v5347_v4 = vld [vmem:[#allocation19_spill] sm:$0xff] }
 0x154   :  { %1336 = vmatpush.bf16.xpose.msrb.mxu3 %v1327_v42  ;;  %5310 = vst [vmem:[#allocation24_spill] sm:$0xff] %v4378_v34  ;;  %v4382_v15 = vpop.f32.mrf.mxu1  ;;  %v5327_v42 = vld [vmem:[#allocation14_spill] sm:$0xff]  ;;  %v697_v0 = vpack.c.bf16 %v4380_v17, %v4380_v17 }
 0x155   :  { %v5329_v11 = vpack.c.b16 %v5327_v42, %v5328_v53 }
 0x156   :  { %v2075_v32 = vunpack.c.l.b16 %v697_v0 }
 0x157   :  { %3550 = vmatmul.msk.bf16.vlgmr.msra.gmra.mxu2 %vm75_vm1, %v5311_v35 }
 0x158   :  { %1426 = vmatpush.bf16.xpose.msra.mxu2 %v1417_v33 }
 0x15a   :  { %v4389_v57 = vpop.f32.mrf.mxu2  ;;  %3545 = vmatmul.msk.bf16.vlgmr.msrb.gmra.mxu1 %vm75_vm1, %v5313_v8  ;;  %3548 = vmatmul.msk.bf16.vlgmr.msra.gmra.mxu0 %vm75_vm1, %v5314_v5 }
 0x15b   :  { %5312 = vst [vmem:[#allocation25_spill] sm:$0xff] %v4389_v57  ;;  %v4399_v61 = vpop.f32.mrf.mxu3  ;;  %3551 = vmatmul.msk.bf16.vlgmr.msra.gmra.mxu3 %vm75_vm1, %v5316_v12  ;;  %v546_v62 = vpop.f32.mrf.mxu0  ;;  %1366 = vmatpush.bf16.xpose.msra.mxu0 %v1357_v7  ;;  %v2217_v7 = vpack.c.b16 %v2216_v60, %v2215_v27  ;;  %v5337_v12 = vld [vmem:[#allocation13_spill] sm:$0xff] }
 0x15c   :  { %5315 = vst [vmem:[#allocation26_spill] sm:$0xff] %v4399_v61  ;;  %v4406_v25 = vpop.f32.mrf.mxu1  ;;  %1276 = vmatpush.bf16.xpose.msrb.mxu1 %v1267_v31  ;;  %1456 = vmatpush.bf16.xpose.msra.mxu3 %v1447_v41  ;;  %v698_v59 = vpack.c.bf16 %v546_v62, %v546_v62  ;;  %v5338_v31 = vpack.c.b16 %v5336_v21, %v5337_v12 }
 0x15d   :  { %v709_v62 = vpack.c.bf16 %v4382_v15, %v4382_v15  ;;  %v710_v46 = vpack.c.bf16 %v4406_v25, %v4406_v25  ;;  %v5348_v15 = vld [vmem:[#allocation17_spill] sm:$0xff] }
 0x15e   :  { %v2076_v5 = vunpack.c.l.b16 %v698_v59  ;;  %v5349_v9 = vpack.c.b16 %v5347_v4, %v5348_v15 }
 0x160   :  { %v2077_v41 = vpack.c.b16 %v2076_v5, %v2075_v32 }
 0x162   :  { %v4416_v23 = vpop.f32.mrf.mxu2 }
 0x163   :  { %5318 = vst [vmem:[#allocation20_spill] sm:$0xff] %v4416_v23  ;;  %v4418_v54 = vpop.f32.mrf.mxu3  ;;  %v549_v45 = vpop.f32.mrf.mxu0 }
 0x164   :  { %5319 = vst [vmem:[#allocation27_spill] sm:$0xff] %v4418_v54  ;;  %v4420_v52 = vpop.f32.mrf.mxu1  ;;  %v699_v2 = vpack.c.bf16 %v549_v45, %v549_v45  ;;  %v5344_v45 = vld [vmem:[#allocation8_spill] sm:$0xff] }
 0x165   :  { %v5345_v14 = vpack.c.b16 %v5343_v22, %v5344_v45 }
 0x166   :  { %v2103_v39 = vunpack.c.l.b16 %v699_v2  ;;  %v2243_v2 = vunpack.c.l.b16 %v709_v62 }
 0x167   :  { %3554 = vmatmul.msk.bf16.vlgmr.msrb.gmra.mxu2 %vm75_vm1, %v5322_v56 }
 0x16a   :  { %v4426_v37 = vpop.f32.mrf.mxu2  ;;  %3549 = vmatmul.msk.bf16.vlgmr.msra.gmra.mxu1 %vm75_vm1, %v5326_v18  ;;  %3552 = vmatmul.msk.bf16.vlgmr.msrb.gmra.mxu0 %vm75_vm1, %v5329_v11 }
 0x16b   :  { %5323 = vst [vmem:[#allocation3_spill] sm:$0xff] %v4426_v37  ;;  %v4436_v13 = vpop.f32.mrf.mxu3  ;;  %3555 = vmatmul.msk.bf16.vlgmr.msrb.gmra.mxu3 %vm75_vm1, %v5333_v20  ;;  %v551_v28 = vpop.f32.mrf.mxu0  ;;  %1396 = vmatpush.bf16.xpose.msra.mxu1 %v1387_v38  ;;  %v5354_v20 = vld [vmem:[#allocation11_spill] sm:$0xff] }
 0x16c   :  { %5330 = vst [vmem:[#allocation2_spill] sm:$0xff] %v4436_v13  ;;  %v4443_v29 = vpop.f32.mrf.mxu1  ;;  %v700_v40 = vpack.c.bf16 %v551_v28, %v551_v28  ;;  %2061 = vmatpush.bf16.msrb.mxu0 %v2049_v1  ;;  %v2244_v1 = vunpack.c.l.b16 %v710_v46  ;;  %v5355_v28 = vld [vmem:[#allocation10_spill] sm:$0xff] }
 0x16e   :  { %v2104_v36 = vunpack.c.l.b16 %v700_v40  ;;  %v2245_v18 = vpack.c.b16 %v2244_v1, %v2243_v2 }
 0x170   :  { %v2105_v43 = vpack.c.b16 %v2104_v36, %v2103_v39  ;;  %v5356_v39 = vpack.c.b16 %v5354_v20, %v5355_v28 }
 0x172   :  { %v4451_v26 = vpop.f32.mrf.mxu2  ;;  %2117 = vmatpush.bf16.msrb.mxu2 %v2105_v43 }
 0x173   :  { %5334 = vst [vmem:[#allocation6_spill] sm:$0xff] %v4451_v26  ;;  %v4453_v35 = vpop.f32.mrf.mxu3  ;;  %v554_v33 = vpop.f32.mrf.mxu0 }
 0x174   :  { %5335 = vst [vmem:[#allocation4_spill] sm:$0xff] %v4453_v35  ;;  %v4455_v8 = vpop.f32.mrf.mxu1  ;;  %v701_v17 = vpack.c.bf16 %v554_v33, %v554_v33 }
 0x176   :  { %v2131_v6 = vunpack.c.l.b16 %v701_v17 }
 0x177   :  { %3558 = vmatmul.msk.bf16.vlgmr.msra.gmra.mxu2 %vm75_vm1, %v5338_v31 }
 0x178   :  { %2229 = vmatpush.bf16.msra.mxu2 %v2217_v7 }
 0x17a   :  { %v4465_v48 = vpop.f32.mrf.mxu2  ;;  %3553 = vmatmul.msk.bf16.vlgmr.msrb.gmra.mxu1 %vm75_vm1, %v5342_v16  ;;  %3556 = vmatmul.msk.bf16.vlgmr.msra.gmra.mxu0 %vm75_vm1, %v5345_v14 }
 0x17b   :  { %5339 = vst [vmem:[#allocation14_spill] sm:$0xff] %v4465_v48  ;;  %v4475_v30 = vpop.f32.mrf.mxu3  ;;  %3559 = vmatmul.msk.bf16.vlgmr.msra.gmra.mxu3 %vm75_vm1, %v5349_v9  ;;  %v556_v25 = vpop.f32.mrf.mxu0  ;;  %2089 = vmatpush.bf16.msrb.mxu1 %v2077_v41 }
 0x17c   :  { %5346 = vst [vmem:[#allocation12_spill] sm:$0xff] %v4475_v30  ;;  %v4481_v49 = vpop.f32.mrf.mxu1  ;;  %v702_v56 = vpack.c.bf16 %v556_v25, %v556_v25 }
 0x17e   :  { %v2132_v3 = vunpack.c.l.b16 %v702_v56 }
 0x180   :  { %v2133_v51 = vpack.c.b16 %v2132_v3, %v2131_v6 }
 0x182   :  { %v4483_v42 = vpop.f32.mrf.mxu2  ;;  %2145 = vmatpush.bf16.msrb.mxu3 %v2133_v51 }
 0x183   :  { %5350 = vst [vmem:[#allocation7_spill] sm:$0xff] %v4483_v42  ;;  %v4485_v53 = vpop.f32.mrf.mxu3  ;;  %v559_v11 = vpop.f32.mrf.mxu0 }
 0x184   :  { %5351 = vst [vmem:[#allocation5_spill] sm:$0xff] %v4485_v53  ;;  %v4487_v38 = vpop.f32.mrf.mxu1  ;;  %v703_v55 = vpack.c.bf16 %v559_v11, %v559_v11 }
 0x185   :  { %5352 = vst [vmem:[#allocation15_spill] sm:$0xff] %v4487_v38 }
 0x186   :  { %2257 = vmatpush.bf16.msra.mxu3 %v2245_v18  ;;  %v2159_v36 = vunpack.c.l.b16 %v703_v55 }
 0x18a   :  { %v4489_v50 = vpop.f32.mrf.mxu2  ;;  %3557 = vmatmul.msk.bf16.vlgmr.msra.gmra.mxu1 %vm75_vm1, %v5356_v39 }
 0x18b   :  { %5353 = vst [vmem:[#allocation13_spill] sm:$0xff] %v4489_v50  ;;  %v4495_v40 = vpop.f32.mrf.mxu3  ;;  %v561_v63 = vpop.f32.mrf.mxu0 }
 0x18c   :  { %5357 = vst [vmem:[#allocation18_spill] sm:$0xff] %v4495_v40  ;;  %v4497_v24 = vpop.f32.mrf.mxu1  ;;  %v704_v43 = vpack.c.bf16 %v561_v63, %v561_v63 }
 0x18d   :  { %5358 = vst [vmem:[#allocation16_spill] sm:$0xff] %v4497_v24 }
 0x18e   :  { %v2160_v0 = vunpack.c.l.b16 %v704_v43 }
 0x190   :  { %v2161_v59 = vpack.c.b16 %v2160_v0, %v2159_v36 }
 0x192   :  { %v4499_v27 = vpop.f32.mrf.mxu2  ;;  %2173 = vmatpush.bf16.msra.mxu0 %v2161_v59 }
 0x193   :  { %5359 = vst [vmem:[#allocation9_spill] sm:$0xff] %v4499_v27  ;;  %v4501_v60 = vpop.f32.mrf.mxu3  ;;  %v564_v33 = vpop.f32.mrf.mxu0 }
 0x194   :  { %5360 = vst [vmem:[#allocation8_spill] sm:$0xff] %v4501_v60  ;;  %v4503_v32 = vpop.f32.mrf.mxu1  ;;  %v705_v5 = vpack.c.bf16 %v564_v33, %v564_v33 }
 0x195   :  { %5361 = vst [vmem:[#allocation19_spill] sm:$0xff] %v4503_v32 }
 0x196   :  { %v2187_v17 = vunpack.c.l.b16 %v705_v5 }
 0x19a   :  { %v4505_v7 = vpop.f32.mrf.mxu2 }
 0x19b   :  { %5362 = vst [vmem:[#allocation17_spill] sm:$0xff] %v4505_v7  ;;  %v4507_v21 = vpop.f32.mrf.mxu3  ;;  %v566_v12 = vpop.f32.mrf.mxu0 }
 0x19c   :  { %5363 = vst [vmem:[#allocation11_spill] sm:$0xff] %v4507_v21  ;;  %v4509_v31 = vpop.f32.mrf.mxu1  ;;  %v706_v62 = vpack.c.bf16 %v566_v12, %v566_v12 }
 0x19d   :  { %5364 = vst [vmem:[#allocation10_spill] sm:$0xff] %v4509_v31 }
 0x19e   :  { %v2188_v41 = vunpack.c.l.b16 %v706_v62 }
 0x1a0   :  { %v2189_v46 = vpack.c.b16 %v2188_v41, %v2187_v17 }
 0x1a2   :  { %v4511_v44 = vpop.f32.mrf.mxu2  ;;  %2201 = vmatpush.bf16.msra.mxu1 %v2189_v46 }
 0x1a3   :  { %5365 = vst [vmem:[#allocation28_spill] sm:$0xff] %v4511_v44  ;;  %v4513_v47 = vpop.f32.mrf.mxu0  ;;  %v4521_v14 = vpop.f32.mrf.mxu3 }
 0x1a4   :  { %v4515_v16 = vpop.f32.mrf.mxu1  ;;  %v1464_v45 = vsel %vm1463_vm2, %v4513_v47, -inf  ;;  %5366 = vst [vmem:[#allocation29_spill] sm:$0xff] %v4521_v14 }
 0x1a5   :  { %v1470_v22 = vsel %vm1463_vm2, %v4515_v16, -inf  ;;  %1465 = vmax.xlane.f32.xlu2 %v1464_v45 }
 0x1a6   :  { %1471 = vmax.xlane.f32.xlu0 %v1470_v22 }
 0x1aa   :  { %v4523_v4 = vpop.f32.mrf.mxu2 }
 0x1ab   :  { %v1476_v15 = vsel %vm1463_vm2, %v4523_v4, -inf  ;;  %v4527_v9 = vpop.f32.mrf.mxu0 }
 0x1ac   :  { %1477 = vmax.xlane.f32.xlu1 %v1476_v15  ;;  %v1467_v25 = vsel %vm1463_vm2, %v4527_v9, -inf  ;;  %v4535_v2 = vpop.f32.mrf.mxu1 }
 0x1ad   :  { %v4531_v6 = vpop.f32.mrf.mxu3  ;;  %1468 = vmax.xlane.f32.xlu2 %v1467_v25  ;;  %v1473_v3 = vsel %vm1463_vm2, %v4535_v2, -inf }
 0x1ae   :  { %v1482_v56 = vsel %vm1463_vm2, %v4531_v6, -inf }
 0x1af   :  { %1483 = vmax.xlane.f32.xlu0 %v1482_v56 }
 0x1b2   :  { %v4537_v1 = vpop.f32.mrf.mxu2 }
 0x1b3   :  { %v1479_v20 = vsel %vm1463_vm2, %v4537_v1, -inf }
 0x1b4   :  { %1474 = vmax.xlane.f32.xlu1 %v1473_v3 }
 0x1b5   :  { %v4541_v51 = vpop.f32.mrf.mxu3 }
 0x1b6   :  { %v1485_v18 = vsel %vm1463_vm2, %v4541_v51, -inf }
 0x1b7   :  { %1486 = vmax.xlane.f32.xlu0 %v1485_v18  ;;  %v4545_v11 = vpop.f32.mrf.mxu0 }
 0x1b8   :  { %v1488_v63 = vsel %vm1463_vm2, %v4545_v11, -inf }
 0x1ba   :  { %v4547_v55 = vpop.f32.mrf.mxu2 }
 0x1bb   :  { %v1500_v0 = vsel %vm1463_vm2, %v4547_v55, -inf }
 0x1bc   :  { %1480 = vmax.xlane.f32.xlu1 %v1479_v20 }
 0x1bd   :  { %v4551_v28 = vpop.f32.mrf.mxu3 }
 0x1be   :  { %v1506_v39 = vsel %vm1463_vm2, %v4551_v28, -inf }
 0x1bf   :  { %1507 = vmax.xlane.f32.xlu2 %v1506_v39  ;;  %1489 = vmax.xlane.f32.xlu0 %v1488_v63  ;;  %v4559_v43 = vpop.f32.mrf.mxu0 }
 0x1c0   :  { %v1491_v62 = vsel %vm1463_vm2, %v4559_v43, -inf }
 0x1c2   :  { %v4557_v36 = vpop.f32.mrf.mxu2 }
 0x1c3   :  { %v1503_v33 = vsel %vm1463_vm2, %v4557_v36, -inf }
 0x1c4   :  { %1501 = vmax.xlane.f32.xlu1 %v1500_v0 }
 0x1c5   :  { %v4563_v59 = vpop.f32.mrf.mxu3 }
 0x1c6   :  { %v1509_v5 = vsel %vm1463_vm2, %v4563_v59, -inf }
 0x1c7   :  { %1504 = vmax.xlane.f32.xlu2 %v1503_v33  ;;  %1510 = vmax.xlane.f32.xlu0 %v1509_v5  ;;  %v4569_v12 = vpop.f32.mrf.mxu1  ;;  %v4575_v41 = vpop.f32.mrf.mxu0 }
 0x1c8   :  { %v1494_v45 = vsel %vm1463_vm2, %v4569_v12, -inf  ;;  %v1512_v3 = vsel %vm1463_vm2, %v4575_v41, -inf }
 0x1ca   :  { %v4571_v17 = vpop.f32.mrf.mxu2 }
 0x1cb   :  { %v1524_v22 = vsel %vm1463_vm2, %v4571_v17, -inf }
 0x1cc   :  { %1492 = vmax.xlane.f32.xlu1 %v1491_v62 }
 0x1ce   :  { %v4577_v46 = vpop.f32.mrf.mxu3 }
 0x1cf   :  { %1525 = vmax.xlane.f32.xlu0 %v1524_v22  ;;  %1495 = vmax.xlane.f32.xlu2 %v1494_v45  ;;  %v4583_v15 = vpop.f32.mrf.mxu1  ;;  %v1530_v25 = vsel %vm1463_vm2, %v4577_v46, -inf  ;;  %v4593_v20 = vpop.f32.mrf.mxu0 }
 0x1d0   :  { %v1497_v18 = vsel %vm1463_vm2, %v4583_v15, -inf  ;;  %v1515_v62 = vsel %vm1463_vm2, %v4593_v20, -inf }
 0x1d2   :  { %v4595_v39 = vpop.f32.mrf.mxu2 }
 0x1d3   :  { %v1527_v0 = vsel %vm1463_vm2, %v4595_v39, -inf }
 0x1d4   :  { %1531 = vmax.xlane.f32.xlu1 %v1530_v25 }
 0x1d6   :  { %v4587_v56 = vpop.f32.mrf.mxu3 }
 0x1d7   :  { %1513 = vmax.xlane.f32.xlu2 %v1512_v3  ;;  %1498 = vmax.xlane.f32.xlu0 %v1497_v18  ;;  %v4597_v63 = vpop.f32.mrf.mxu1  ;;  %v1533_v5 = vsel %vm1463_vm2, %v4587_v56, -inf  ;;  %v4607_v22 = vpop.f32.mrf.mxu0 }
 0x1d8   :  { %v1518_v3 = vsel %vm1463_vm2, %v4597_v63, -inf  ;;  %v1536_v18 = vsel %vm1463_vm2, %v4607_v22, -inf }
 0x1da   :  { %v4609_v45 = vpop.f32.mrf.mxu2 }
 0x1dc   :  { %1528 = vmax.xlane.f32.xlu1 %v1527_v0 }
 0x1de   :  { %v4601_v33 = vpop.f32.mrf.mxu3 }
 0x1df   :  { %1534 = vmax.xlane.f32.xlu2 %v1533_v5  ;;  %1516 = vmax.xlane.f32.xlu0 %v1515_v62  ;;  %v4611_v25 = vpop.f32.mrf.mxu1  ;;  %v1554_v0 = vsel %vm1463_vm2, %v4601_v33, -inf  ;;  %v4621_v62 = vpop.f32.mrf.mxu0 }
 0x1e0   :  { %v1539_v35 = vsel %vm1463_vm2, %v4621_v62, -inf  ;;  %v1521_v14 = vsel %vm1463_vm2, %v4611_v25, -inf }
 0x1e2   :  { %v4623_v30 = vpop.f32.mrf.mxu2 }
 0x1e4   :  { %1519 = vmax.xlane.f32.xlu1 %v1518_v3  ;;  %v1548_v3 = vsel %vm1463_vm2, %v4609_v45, -inf }
 0x1e6   :  { %v4619_v5 = vpop.f32.mrf.mxu3 }
 0x1e7   :  { %1537 = vmax.xlane.f32.xlu2 %v1536_v18  ;;  %1555 = vmax.xlane.f32.xlu0 %v1554_v0  ;;  %v1557_v53 = vsel %vm1463_vm2, %v4619_v5, -inf  ;;  %v4627_v13 = vpop.f32.mrf.mxu1  ;;  %v4637_v21 = vpop.f32.mrf.mxu0 }
 0x1e8   :  { %v1542_v18 = vsel %vm1463_vm2, %v4627_v13, -inf }
 0x1ea   :  { %v4635_v0 = vpop.f32.mrf.mxu2 }
 0x1ec   :  { %1558 = vmax.xlane.f32.xlu1 %v1557_v53  ;;  %v1551_v53 = vsel %vm1463_vm2, %v4623_v30, -inf }
 0x1ef   :  { %1549 = vmax.xlane.f32.xlu2 %v1548_v3  ;;  %1540 = vmax.xlane.f32.xlu0 %v1539_v35  ;;  %v4643_v7 = vpop.f32.mrf.mxu1  ;;  %v1572_v35 = vsel %vm1463_vm2, %v4635_v0, -inf  ;;  %v4647_v3 = vpop.f32.mrf.mxu3 }
 0x1f0   :  { %v1545_v44 = vsel %vm1463_vm2, %v4643_v7, -inf  ;;  %v4655_v40 = vpop.f32.mrf.mxu0 }
 0x1f2   :  { %v4653_v60 = vpop.f32.mrf.mxu2 }
 0x1f3   :  { %v1575_v50 = vsel %vm1463_vm2, %v4653_v60, -inf }
 0x1f4   :  { %1543 = vmax.xlane.f32.xlu1 %v1542_v18  ;;  %v1560_v18 = vsel %vm1463_vm2, %v4637_v21, -inf }
 0x1f7   :  { %1552 = vmax.xlane.f32.xlu0 %v1551_v53  ;;  %1522 = vmax.xlane.f32.xlu2 %v1521_v14  ;;  %v4657_v53 = vpop.f32.mrf.mxu1  ;;  %v1563_v14 = vsel %vm1463_vm2, %v4655_v40, -inf  ;;  %v4665_v23 = vpop.f32.mrf.mxu3 }
 0x1f8   :  { %v1581_v57 = vsel %vm1463_vm2, %v4665_v23, -inf }
 0x1fc   :  { %1573 = vmax.xlane.f32.xlu1 %v1572_v35  ;;  %v1578_v35 = vsel %vm1463_vm2, %v4647_v3, -inf }
 0x1ff   :  { %1561 = vmax.xlane.f32.xlu0 %v1560_v18  ;;  %1546 = vmax.xlane.f32.xlu2 %v1545_v44  ;;  %v4667_v18 = vpop.f32.mrf.mxu2  ;;  %v4669_v44 = vpop.f32.mrf.mxu1 }
 0x200   :  { %v1569_v19 = vsel %vm1463_vm2, %v4669_v44, -inf  ;;  %v4689_v34 = vpop.f32.mrf.mxu3 }
 0x204   :  { %1564 = vmax.xlane.f32.xlu1 %v1563_v14  ;;  %v1566_v14 = vsel %vm1463_vm2, %v4657_v53, -inf }
 0x207   :  { %1579 = vmax.xlane.f32.xlu0 %v1578_v35  ;;  %1576 = vmax.xlane.f32.xlu2 %v1575_v50  ;;  %v4677_v35 = vpop.f32.mrf.mxu0  ;;  %v4679_v50 = vpop.f32.mrf.mxu2 }
 0x208   :  { %v1584_v27 = vsel %vm1463_vm2, %v4677_v35, -inf  ;;  %v4683_v54 = vpop.f32.mrf.mxu1  ;;  %v1599_v61 = vsel %vm1463_vm2, %v4679_v50, -inf }
 0x20c   :  { %1582 = vmax.xlane.f32.xlu1 %v1581_v57  ;;  %v1596_v57 = vsel %vm1463_vm2, %v4667_v18, -inf }
 0x20f   :  { %1567 = vmax.xlane.f32.xlu2 %v1566_v14  ;;  %1570 = vmax.xlane.f32.xlu0 %v1569_v19  ;;  %v4692_v37 = vpop.f32.mrf.mxu0 }
 0x210   :  { %v1587_v48 = vsel %vm1463_vm2, %v4692_v37, -inf }
 0x214   :  { %1585 = vmax.xlane.f32.xlu1 %v1584_v27  ;;  %v1602_v27 = vsel %vm1463_vm2, %v4689_v34, -inf }
 0x217   :  { %1597 = vmax.xlane.f32.xlu2 %v1596_v57  ;;  %1600 = vmax.xlane.f32.xlu0 %v1599_v61  ;;  %v1590_v61 = vsel %vm1463_vm2, %v4683_v54, -inf }
 0x218   :  { %v1466_v14 = vpop.xlane.xlu2 %1465 }
 0x219   :  { %v1472_v19 = vpop.xlane.xlu0 %1471  ;;  %v1608_v26 = vsub.f32 %v4513_v47, %v1466_v14 }
 0x21a   :  { %v1610_v10 = vsub.f32 %v4515_v16, %v1472_v19  ;;  %v4701_v16 = vpop.f32.mrf.mxu1 }
 0x21b   :  { %v1656_v19 = vmul.f32 1.442695, %v1608_v26  ;;  %v1593_v14 = vsel %vm1463_vm2, %v4701_v16, -inf }
 0x21c   :  { %v1660_v58 = vmul.f32 1.442695, %v1610_v10  ;;  %1603 = vmax.xlane.f32.xlu1 %v1602_v27 }
 0x21e   :  { %3622 = vpow2.f32 %v1660_v58  ;;  %v4706_v58 = vpop.f32.mrf.mxu3 }
 0x21f   :  { %v1478_v57 = vpop.xlane.xlu1 %1477  ;;  %1588 = vmax.xlane.f32.xlu2 %v1587_v48  ;;  %1591 = vmax.xlane.f32.xlu0 %v1590_v61  ;;  %3624 = vpow2.f32 %v1656_v19  ;;  %v1605_v26 = vsel %vm1463_vm2, %v4706_v58, -inf }
 0x220   :  { %v1612_v10 = vsub.f32 %v4523_v4, %v1478_v57  ;;  %v1469_v24 = vpop.xlane.xlu2 %1468 }
 0x221   :  { %v1609_v48 = vsub.f32 %v4527_v9, %v1469_v24 }
 0x222   :  { %v1664_v42 = vmul.f32 1.442695, %v1612_v10  ;;  %v1484_v38 = vpop.xlane.xlu0 %1483 }
 0x223   :  { %v1658_v57 = vmul.f32 1.442695, %v1609_v48  ;;  %v1614_v19 = vsub.f32 %v4531_v6, %v1484_v38 }
 0x224   :  { %v4704_v47 = vpop.eup %3622  ;;  %1594 = vmax.xlane.f32.xlu1 %v1593_v14  ;;  %3626 = vpow2.f32 %v1664_v42 }
 0x225   :  { %v1758_v4 = vsel %vm1463_vm2, %v4704_v47, 0.0  ;;  %v4716_v10 = vpop.eup %3624  ;;  %v1668_v32 = vmul.f32 1.442695, %v1614_v19 }
 0x227   :  { %v1475_v27 = vpop.xlane.xlu1 %1474  ;;  %1606 = vmax.xlane.f32.xlu2 %v1605_v26  ;;  %1759 = vadd.xlane.f32.xlu0 %v1758_v4  ;;  %v1752_v26 = vsel %vm1463_vm2, %v4716_v10, 0.0 }
 0x228   :  { %v1611_v61 = vsub.f32 %v4535_v2, %v1475_v27 }
 0x22a   :  { %v1662_v14 = vmul.f32 1.442695, %v1611_v61  ;;  %v1487_v42 = vpop.xlane.xlu0 %1486  ;;  %v4719_v31 = vpop.eup %3626 }
 0x22b   :  { %v1615_v24 = vsub.f32 %v4541_v51, %v1487_v42  ;;  %v1764_v2 = vsel %vm1463_vm2, %v4719_v31, 0.0 }
 0x22c   :  { %3628 = vpow2.f32 %v1662_v14 }
 0x22d   :  { %3630 = vpow2.f32 %v1658_v57  ;;  %v1670_v9 = vmul.f32 1.442695, %v1615_v24 }
 0x22f   :  { %3632 = vpow2.f32 %v1670_v9  ;;  %v1481_v48 = vpop.xlane.xlu1 %1480  ;;  %1753 = vadd.xlane.f32.xlu2 %v1752_v26  ;;  %1765 = vadd.xlane.f32.xlu0 %v1764_v2 }
 0x230   :  { %3634 = vpow2.f32 %v1668_v32  ;;  %v1613_v6 = vsub.f32 %v4537_v1, %v1481_v48 }
 0x232   :  { %v4726_v38 = vpop.eup %3628  ;;  %v1508_v51 = vpop.xlane.xlu2 %1507  ;;  %v1666_v9 = vmul.f32 1.442695, %v1613_v6 }
 0x233   :  { %v1490_v4 = vpop.xlane.xlu0 %1489  ;;  %v4729_v27 = vpop.eup %3630  ;;  %v1622_v61 = vsub.f32 %v4551_v28, %v1508_v51  ;;  %v1761_v19 = vsel %vm1463_vm2, %v4726_v38, 0.0 }
 0x234   :  { %v1616_v57 = vsub.f32 %v4545_v11, %v1490_v4  ;;  %1762 = vadd.xlane.f32.xlu1 %v1761_v19  ;;  %v1755_v1 = vsel %vm1463_vm2, %v4729_v27, 0.0 }
 0x235   :  { %v4735_v14 = vpop.eup %3632  ;;  %v1684_v42 = vmul.f32 1.442695, %v1622_v61 }
 0x236   :  { %v1672_v24 = vmul.f32 1.442695, %v1616_v57  ;;  %v1773_v32 = vsel %vm1463_vm2, %v4735_v14, 0.0  ;;  %v4741_v11 = vpop.eup %3634 }
 0x237   :  { %3636 = vpow2.f32 %v1684_v42  ;;  %v1502_v26 = vpop.xlane.xlu1 %1501  ;;  %1774 = vadd.xlane.f32.xlu2 %v1773_v32  ;;  %1756 = vadd.xlane.f32.xlu0 %v1755_v1  ;;  %v1770_v4 = vsel %vm1463_vm2, %v4741_v11, 0.0 }
 0x238   :  { %3638 = vpow2.f32 %v1672_v24  ;;  %v1620_v28 = vsub.f32 %v4547_v55, %v1502_v26 }
 0x239   :  { %3640 = vpow2.f32 %v1666_v9 }
 0x23a   :  { %v1505_v2 = vpop.xlane.xlu2 %1504  ;;  %v1680_v24 = vmul.f32 1.442695, %v1620_v28 }
 0x23b   :  { %v1511_v48 = vpop.xlane.xlu0 %1510  ;;  %v1621_v6 = vsub.f32 %v4557_v36, %v1505_v2 }
 0x23c   :  { %v1623_v51 = vsub.f32 %v4563_v59, %v1511_v48  ;;  %1771 = vadd.xlane.f32.xlu1 %v1770_v4 }
 0x23d   :  { %v4748_v61 = vpop.eup %3636  ;;  %v1682_v57 = vmul.f32 1.442695, %v1621_v6 }
 0x23e   :  { %v1686_v19 = vmul.f32 1.442695, %v1623_v51  ;;  %v4750_v42 = vpop.eup %3638  ;;  %v1794_v55 = vsel %vm1463_vm2, %v4748_v61, 0.0 }
 0x23f   :  { %5367 = vst [vmem:[#allocation30_spill] sm:$0xff] %v4750_v42  ;;  %3642 = vpow2.f32 %v1682_v57  ;;  %v1493_v9 = vpop.xlane.xlu1 %1492  ;;  %1795 = vadd.xlane.f32.xlu2 %v1794_v55  ;;  %v1776_v36 = vsel %vm1463_vm2, %v4750_v42, 0.0  ;;  %v4756_v59 = vpop.eup %3640 }
 0x240   :  { %3644 = vpow2.f32 %v1686_v19  ;;  %1777 = vadd.xlane.f32.xlu0 %v1776_v36  ;;  %v1617_v32 = vsub.f32 %v4559_v43, %v1493_v9  ;;  %v1767_v28 = vsel %vm1463_vm2, %v4756_v59, 0.0 }
 0x241   :  { %3646 = vpow2.f32 %v1680_v24 }
 0x242   :  { %v1496_v26 = vpop.xlane.xlu2 %1495  ;;  %v1674_v6 = vmul.f32 1.442695, %v1617_v32 }
 0x243   :  { %v1526_v1 = vpop.xlane.xlu0 %1525  ;;  %v1618_v24 = vsub.f32 %v4569_v12, %v1496_v26 }
 0x244   :  { %1768 = vadd.xlane.f32.xlu1 %v1767_v28  ;;  %3648 = vpow2.f32 %v1674_v6 }
 0x245   :  { %v4761_v2 = vpop.eup %3642 }
 0x246   :  { %5368 = vst [vmem:[#allocation31_spill] sm:$0xff] %v4761_v2  ;;  %v4763_v48 = vpop.eup %3644  ;;  %v1791_v51 = vsel %vm1463_vm2, %v4761_v2, 0.0  ;;  %v1676_v2 = vmul.f32 1.442695, %v1618_v24 }
 0x247   :  { %v1532_v4 = vpop.xlane.xlu1 %1531  ;;  %1792 = vadd.xlane.f32.xlu2 %v1791_v51  ;;  %v1797_v57 = vsel %vm1463_vm2, %v4763_v48, 0.0  ;;  %v4769_v43 = vpop.eup %3646  ;;  %v1628_v51 = vsub.f32 %v4571_v17, %v1526_v1 }
 0x248   :  { %v1630_v19 = vsub.f32 %v4577_v46, %v1532_v4  ;;  %1798 = vadd.xlane.f32.xlu0 %v1797_v57  ;;  %v1788_v28 = vsel %vm1463_vm2, %v4769_v43, 0.0 }
 0x249   :  { %v1696_v6 = vmul.f32 1.442695, %v1628_v51 }
 0x24a   :  { %v1700_v55 = vmul.f32 1.442695, %v1630_v19  ;;  %v1514_v9 = vpop.xlane.xlu2 %1513  ;;  %v4777_v4 = vpop.eup %3648 }
 0x24b   :  { %v1499_v36 = vpop.xlane.xlu0 %1498  ;;  %v1624_v32 = vsub.f32 %v4575_v41, %v1514_v9  ;;  %v1779_v17 = vsel %vm1463_vm2, %v4777_v4, 0.0 }
 0x24c   :  { %3650 = vpow2.f32 %v1700_v55  ;;  %1789 = vadd.xlane.f32.xlu1 %v1788_v28  ;;  %v1619_v1 = vsub.f32 %v4583_v15, %v1499_v36 }
 0x24d   :  { %v1688_v42 = vmul.f32 1.442695, %v1624_v32 }
 0x24e   :  { %v1678_v28 = vmul.f32 1.442695, %v1619_v1 }
 0x24f   :  { %3652 = vpow2.f32 %v1688_v42  ;;  %v1529_v46 = vpop.xlane.xlu1 %1528 }
 0x250   :  { %3654 = vpow2.f32 %v1676_v2  ;;  %v1629_v24 = vsub.f32 %v4595_v39, %v1529_v46 }
 0x251   :  { %3656 = vpow2.f32 %v1696_v6 }
 0x252   :  { %v4779_v12 = vpop.eup %3650  ;;  %v1535_v26 = vpop.xlane.xlu2 %1534  ;;  %v1698_v51 = vmul.f32 1.442695, %v1629_v24 }
 0x253   :  { %v1517_v57 = vpop.xlane.xlu0 %1516  ;;  %v1631_v41 = vsub.f32 %v4587_v56, %v1535_v26  ;;  %v1818_v55 = vsel %vm1463_vm2, %v4779_v12, 0.0 }
 0x254   :  { %v1625_v19 = vsub.f32 %v4593_v20, %v1517_v57  ;;  %1819 = vadd.xlane.f32.xlu0 %v1818_v55  ;;  %1780 = vadd.xlane.f32.xlu1 %v1779_v17 }
 0x255   :  { %v4787_v42 = vpop.eup %3652  ;;  %v1702_v9 = vmul.f32 1.442695, %v1631_v41 }
 0x256   :  { %v1690_v2 = vmul.f32 1.442695, %v1625_v19  ;;  %v1800_v56 = vsel %vm1463_vm2, %v4787_v42, 0.0  ;;  %v4793_v32 = vpop.eup %3654 }
 0x257   :  { %v1520_v20 = vpop.xlane.xlu1 %1519  ;;  %1801 = vadd.xlane.f32.xlu2 %v1800_v56  ;;  %v4796_v15 = vpop.eup %3656  ;;  %v1782_v39 = vsel %vm1463_vm2, %v4793_v32, 0.0 }
 0x258   :  { %3658 = vpow2.f32 %v1690_v2  ;;  %v1626_v26 = vsub.f32 %v4597_v63, %v1520_v20  ;;  %v1812_v19 = vsel %vm1463_vm2, %v4796_v15, 0.0 }
 0x259   :  { %3660 = vpow2.f32 %v1702_v9 }
 0x25a   :  { %v1538_v6 = vpop.xlane.xlu2 %1537  ;;  %3662 = vpow2.f32 %v1678_v28  ;;  %v1692_v46 = vmul.f32 1.442695, %v1626_v26 }
 0x25b   :  { %v1556_v57 = vpop.xlane.xlu0 %1555  ;;  %3664 = vpow2.f32 %v1698_v51  ;;  %v1632_v1 = vsub.f32 %v4607_v22, %v1538_v6 }
 0x25c   :  { %1783 = vadd.xlane.f32.xlu1 %v1782_v39  ;;  %v1638_v41 = vsub.f32 %v4601_v33, %v1556_v57  ;;  %3666 = vpow2.f32 %v1692_v46 }
 0x25d   :  { %v1704_v26 = vmul.f32 1.442695, %v1632_v1 }
 0x25e   :  { %v4800_v36 = vpop.eup %3658  ;;  %v1716_v2 = vmul.f32 1.442695, %v1638_v41 }
 0x25f   :  { %v1559_v55 = vpop.xlane.xlu1 %1558  ;;  %1813 = vadd.xlane.f32.xlu2 %v1812_v19  ;;  %v1803_v63 = vsel %vm1463_vm2, %v4800_v36, 0.0  ;;  %v4807_v17 = vpop.eup %3660 }
 0x260   :  { %1804 = vadd.xlane.f32.xlu0 %v1803_v63  ;;  %v4810_v56 = vpop.eup %3662  ;;  %v1821_v20 = vsel %vm1463_vm2, %v4807_v17, 0.0  ;;  %3668 = vpow2.f32 %v1716_v2 }
 0x261   :  { %v4815_v28 = vpop.eup %3664  ;;  %v1785_v57 = vsel %vm1463_vm2, %v4810_v56, 0.0 }
 0x262   :  { %v1550_v24 = vpop.xlane.xlu2 %1549  ;;  %v1815_v6 = vsel %vm1463_vm2, %v4815_v28, 0.0  ;;  %v4821_v39 = vpop.eup %3666 }
 0x263   :  { %v1541_v9 = vpop.xlane.xlu0 %1540  ;;  %v1636_v33 = vsub.f32 %v4609_v45, %v1550_v24  ;;  %v1639_v45 = vsub.f32 %v4619_v5, %v1559_v55  ;;  %v1806_v1 = vsel %vm1463_vm2, %v4821_v39, 0.0 }
 0x264   :  { %1822 = vadd.xlane.f32.xlu1 %v1821_v20 }
 0x265   :  { %v1712_v51 = vmul.f32 1.442695, %v1636_v33  ;;  %v1633_v33 = vsub.f32 %v4621_v62, %v1541_v9 }
 0x266   :  { %v4828_v2 = vpop.eup %3668 }
 0x267   :  { %3670 = vpow2.f32 %v1712_v51  ;;  %v1544_v22 = vpop.xlane.xlu1 %1543  ;;  %1786 = vadd.xlane.f32.xlu2 %v1785_v57  ;;  %v1842_v55 = vsel %vm1463_vm2, %v4828_v2, 0.0 }
 0x268   :  { %1816 = vadd.xlane.f32.xlu0 %v1815_v6  ;;  %3672 = vpow2.f32 %v1704_v26  ;;  %v1718_v26 = vmul.f32 1.442695, %v1639_v45  ;;  %v1634_v5 = vsub.f32 %v4627_v13, %v1544_v22  ;;  %v1706_v6 = vmul.f32 1.442695, %v1633_v33 }
 0x26a   :  { %v1523_v41 = vpop.xlane.xlu2 %1522  ;;  %v1708_v62 = vmul.f32 1.442695, %v1634_v5 }
 0x26b   :  { %v1553_v46 = vpop.xlane.xlu0 %1552  ;;  %v1627_v63 = vsub.f32 %v4611_v25, %v1523_v41 }
 0x26c   :  { %v1637_v19 = vsub.f32 %v4623_v30, %v1553_v46  ;;  %1807 = vadd.xlane.f32.xlu1 %v1806_v1 }
 0x26d   :  { %v4830_v24 = vpop.eup %3670  ;;  %v1694_v51 = vmul.f32 1.442695, %v1627_v63 }
 0x26e   :  { %v1714_v20 = vmul.f32 1.442695, %v1637_v19  ;;  %v1836_v30 = vsel %vm1463_vm2, %v4830_v24, 0.0  ;;  %v4838_v57 = vpop.eup %3672 }
 0x26f   :  { %v1574_v25 = vpop.xlane.xlu1 %1573  ;;  %1837 = vadd.xlane.f32.xlu2 %v1836_v30  ;;  %v1824_v22 = vsel %vm1463_vm2, %v4838_v57, 0.0 }
 0x270   :  { %3674 = vpow2.f32 %v1714_v20  ;;  %1843 = vadd.xlane.f32.xlu0 %v1842_v55  ;;  %v1644_v9 = vsub.f32 %v4635_v0, %v1574_v25 }
 0x271   :  { %3676 = vpow2.f32 %v1694_v51 }
 0x272   :  { %3678 = vpow2.f32 %v1718_v26  ;;  %v1547_v13 = vpop.xlane.xlu2 %1546  ;;  %v1728_v19 = vmul.f32 1.442695, %v1644_v9 }
 0x273   :  { %v1562_v45 = vpop.xlane.xlu0 %1561  ;;  %3680 = vpow2.f32 %v1706_v6  ;;  %v1635_v20 = vsub.f32 %v4643_v7, %v1547_v13 }
 0x274   :  { %1825 = vadd.xlane.f32.xlu1 %v1824_v22  ;;  %3682 = vpow2.f32 %v1708_v62 }
 0x275   :  { %3684 = vpow2.f32 %v1728_v19  ;;  %v1710_v62 = vmul.f32 1.442695, %v1635_v20 }
 0x276   :  { %v4843_v46 = vpop.eup %3674 }
 0x277   :  { %v4845_v41 = vpop.eup %3676  ;;  %v1839_v63 = vsel %vm1463_vm2, %v4843_v46, 0.0  ;;  %v1565_v1 = vpop.xlane.xlu1 %1564 }
 0x278   :  { %v1809_v0 = vsel %vm1463_vm2, %v4845_v41, 0.0  ;;  %v4851_v33 = vpop.eup %3678  ;;  %1840 = vadd.xlane.f32.xlu0 %v1839_v63  ;;  %v1640_v63 = vsub.f32 %v4637_v21, %v1562_v45 }
 0x279   :  { %1810 = vadd.xlane.f32.xlu2 %v1809_v0  ;;  %v4854_v5 = vpop.eup %3680  ;;  %v1845_v25 = vsel %vm1463_vm2, %v4851_v33, 0.0  ;;  %v1641_v0 = vsub.f32 %v4655_v40, %v1565_v1 }
 0x27a   :  { %v1577_v26 = vpop.xlane.xlu2 %1576  ;;  %v4859_v55 = vpop.eup %3682  ;;  %v1827_v7 = vsel %vm1463_vm2, %v4854_v5, 0.0 }
 0x27b   :  { %v1580_v51 = vpop.xlane.xlu0 %1579  ;;  %v1645_v9 = vsub.f32 %v4653_v60, %v1577_v26  ;;  %v1830_v13 = vsel %vm1463_vm2, %v4859_v55, 0.0  ;;  %v4866_v19 = vpop.eup %3684 }
 0x27c   :  { %v1646_v30 = vsub.f32 %v4647_v3, %v1580_v51  ;;  %1846 = vadd.xlane.f32.xlu1 %v1845_v25 }
 0x27d   :  { %v1730_v60 = vmul.f32 1.442695, %v1645_v9 }
 0x27e   :  { %v1732_v6 = vmul.f32 1.442695, %v1646_v30  ;;  %v1860_v30 = vsel %vm1463_vm2, %v4866_v19, 0.0 }
 0x27f   :  { %v1583_v22 = vpop.xlane.xlu1 %1582 }
 0x280   :  { %3686 = vpow2.f32 %v1732_v6  ;;  %v1647_v3 = vsub.f32 %v4665_v23, %v1583_v22  ;;  %1831 = vadd.xlane.f32.xlu0 %v1830_v13  ;;  %v1720_v6 = vmul.f32 1.442695, %v1640_v63  ;;  %v1722_v23 = vmul.f32 1.442695, %v1641_v0 }
 0x281   :  { %1828 = vadd.xlane.f32.xlu2 %v1827_v7  ;;  %3688 = vpow2.f32 %v1710_v62 }
 0x282   :  { %v1734_v20 = vmul.f32 1.442695, %v1647_v3  ;;  %v1568_v51 = vpop.xlane.xlu2 %1567 }
 0x283   :  { %v1571_v26 = vpop.xlane.xlu0 %1570  ;;  %v1642_v22 = vsub.f32 %v4657_v53, %v1568_v51 }
 0x284   :  { %3690 = vpow2.f32 %v1734_v20  ;;  %1861 = vadd.xlane.f32.xlu1 %v1860_v30  ;;  %v1643_v9 = vsub.f32 %v4669_v44, %v1571_v26 }
 0x285   :  { %3692 = vpow2.f32 %v1730_v60  ;;  %v1724_v62 = vmul.f32 1.442695, %v1642_v22 }
 0x286   :  { %v4873_v25 = vpop.eup %3686  ;;  %3694 = vpow2.f32 %v1720_v6  ;;  %v1726_v0 = vmul.f32 1.442695, %v1643_v9 }
 0x287   :  { %v1866_v21 = vsel %vm1463_vm2, %v4873_v25, 0.0  ;;  %v1586_v40 = vpop.xlane.xlu1 %1585  ;;  %v4878_v45 = vpop.eup %3688  ;;  %3696 = vpow2.f32 %v1722_v23 }
 0x288   :  { %v1833_v53 = vsel %vm1463_vm2, %v4878_v45, 0.0  ;;  %3698 = vpow2.f32 %v1724_v62 }
 0x289   :  { %1867 = vadd.xlane.f32.xlu2 %v1866_v21  ;;  %3700 = vpow2.f32 %v1726_v0 }
 0x28a   :  { %v4880_v1 = vpop.eup %3690  ;;  %v1598_v7 = vpop.xlane.xlu2 %1597 }
 0x28b   :  { %v1601_v13 = vpop.xlane.xlu0 %1600  ;;  %v1869_v3 = vsel %vm1463_vm2, %v4880_v1, 0.0  ;;  %v4887_v63 = vpop.eup %3692  ;;  %v1652_v30 = vsub.f32 %v4667_v18, %v1598_v7 }
 0x28c   :  { %1870 = vadd.xlane.f32.xlu0 %v1869_v3  ;;  %1834 = vadd.xlane.f32.xlu1 %v1833_v53  ;;  %v4889_v60 = vpop.eup %3694  ;;  %v1863_v44 = vsel %vm1463_vm2, %v4887_v63, 0.0  ;;  %v1653_v6 = vsub.f32 %v4679_v50, %v1601_v13 }
 0x28d   :  { %v4893_v51 = vpop.eup %3696  ;;  %v1848_v62 = vsel %vm1463_vm2, %v4889_v60, 0.0 }
 0x28e   :  { %v1851_v9 = vsel %vm1463_vm2, %v4893_v51, 0.0  ;;  %v4902_v3 = vpop.eup %3698  ;;  %v1746_v53 = vmul.f32 1.442695, %v1653_v6 }
 0x28f   :  { %v1604_v20 = vpop.xlane.xlu1 %1603  ;;  %v1854_v18 = vsel %vm1463_vm2, %v4902_v3, 0.0  ;;  %v4906_v50 = vpop.eup %3700 }
 0x290   :  { %v1654_v26 = vsub.f32 %v4689_v34, %v1604_v20  ;;  %v1744_v34 = vmul.f32 1.442695, %v1652_v30  ;;  %v1857_v30 = vsel %vm1463_vm2, %v4906_v50, 0.0 }
 0x291   :  { %1864 = vadd.xlane.f32.xlu2 %v1863_v44 }
 0x292   :  { %v1748_v23 = vmul.f32 1.442695, %v1654_v26  ;;  %v1589_v22 = vpop.xlane.xlu2 %1588 }
 0x293   :  { %v1592_v21 = vpop.xlane.xlu0 %1591  ;;  %v1649_v7 = vsub.f32 %v4692_v37, %v1589_v22  ;;  %v1648_v37 = vsub.f32 %v4677_v35, %v1586_v40 }
 0x294   :  { %3702 = vpow2.f32 %v1748_v23  ;;  %1849 = vadd.xlane.f32.xlu0 %v1848_v62  ;;  %1852 = vadd.xlane.f32.xlu1 %v1851_v9  ;;  %v1650_v0 = vsub.f32 %v4683_v54, %v1592_v21 }
 0x295   :  { %3704 = vpow2.f32 %v1744_v34  ;;  %v1738_v23 = vmul.f32 1.442695, %v1649_v7 }
 0x296   :  { %3706 = vpow2.f32 %v1746_v53  ;;  %v1740_v62 = vmul.f32 1.442695, %v1650_v0 }
 0x297   :  { %v1595_v54 = vpop.xlane.xlu1 %1594 }
 0x298   :  { %v1651_v7 = vsub.f32 %v4701_v16, %v1595_v54 }
 0x299   :  { %1855 = vadd.xlane.f32.xlu2 %v1854_v18 }
 0x29a   :  { %v4909_v13 = vpop.eup %3702  ;;  %v1607_v20 = vpop.xlane.xlu2 %1606 }
 0x29b   :  { %v1760_v44 = vpop.xlane.xlu0 %1759  ;;  %v1655_v26 = vsub.f32 %v4706_v58, %v1607_v20  ;;  %v1890_v6 = vsel %vm1463_vm2, %v4909_v13, 0.0  ;;  %v4918_v9 = vpop.eup %3704  ;;  %v1736_v58 = vmul.f32 1.442695, %v1648_v37 }
 0x29c   :  { %1858 = vadd.xlane.f32.xlu0 %v1857_v30  ;;  %1891 = vadd.xlane.f32.xlu1 %v1890_v6  ;;  %v4920_v21 = vpop.eup %3706  ;;  %v1884_v18 = vsel %vm1463_vm2, %v4918_v9, 0.0  ;;  %v1742_v6 = vmul.f32 1.442695, %v1651_v7 }
 0x29d   :  { %v1750_v22 = vmul.f32 1.442695, %v1655_v26  ;;  %v1887_v35 = vsel %vm1463_vm2, %v4920_v21, 0.0 }
 0x29f   :  { %3708 = vpow2.f32 %v1750_v22 }
 0x2a0   :  { %3710 = vpow2.f32 %v1738_v23 }
 0x2a1   :  { %3712 = vrcp.f32 %v1760_v44 }
 0x2a2   :  { %3714 = vpow2.f32 %v1740_v62  ;;  %v1754_v34 = vpop.xlane.xlu2 %1753 }
 0x2a3   :  { %v1766_v53 = vpop.xlane.xlu0 %1765  ;;  %3716 = vpow2.f32 %v1736_v58 }
 0x2a4   :  { %1885 = vadd.xlane.f32.xlu0 %v1884_v18  ;;  %1888 = vadd.xlane.f32.xlu1 %v1887_v35  ;;  %3718 = vrcp.f32 %v1754_v34  ;;  %v714_v18 = vpack.c.bf16 %v4481_v49, %v4481_v49 }
 0x2a5   :  { %v4926_v40 = vpop.eup %3708 }
 0x2a6   :  { %5369 = vst [vmem:[#allocation32_spill] sm:$0xff] %v4926_v40  ;;  %v4929_v0 = vpop.eup %3710  ;;  %v1893_v20 = vsel %vm1463_vm2, %v4926_v40, 0.0  ;;  %v5373_v40 = vld [vmem:[#allocation19_spill] sm:$0xff] }
 0x2a7   :  { %5370 = vst [vmem:[#allocation33_spill] sm:$0xff] %v4929_v0  ;;  %v3713_v44 = vpop.eup %3712  ;;  %v1763_v26 = vpop.xlane.xlu1 %1762  ;;  %1894 = vadd.xlane.f32.xlu2 %v1893_v20  ;;  %v1875_v16 = vsel %vm1463_vm2, %v4929_v0, 0.0 }
 0x2a8   :  { %v4933_v30 = vpop.eup %3714  ;;  %3720 = vrcp.f32 %v1763_v26  ;;  %v1946_v23 = vmul.f32 %v3713_v44, %v4704_v47  ;;  %v713_v47 = vpack.c.bf16 %v4455_v8, %v4455_v8  ;;  %v712_v8 = vpack.c.bf16 %v4443_v29, %v4443_v29 }
 0x2a9   :  { %5371 = vst [vmem:[#allocation34_spill] sm:$0xff] %v4933_v30  ;;  %v4936_v62 = vpop.eup %3716  ;;  %v1878_v54 = vsel %vm1463_vm2, %v4933_v30, 0.0 }
 0x2aa   :  { %v1775_v37 = vpop.xlane.xlu2 %1774  ;;  %5372 = vst [vmem:[#allocation35_spill] sm:$0xff] %v4936_v62  ;;  %v3719_v58 = vpop.eup %3718  ;;  %v1994_v35 = vpack.c.bf16 %v1946_v23, %v1946_v23  ;;  %v1872_v7 = vsel %vm1463_vm2, %v4936_v62, 0.0 }
 0x2ab   :  { %v1757_v22 = vpop.xlane.xlu0 %1756  ;;  %3722 = vrcp.f32 %v1775_v37  ;;  %v1944_v20 = vmul.f32 %v3719_v58, %v4716_v10 }
 0x2ac   :  { %3724 = vrcp.f32 %v1757_v22  ;;  %1876 = vadd.xlane.f32.xlu0 %v1875_v16  ;;  %1879 = vadd.xlane.f32.xlu1 %v1878_v54  ;;  %v2299_v22 = vunpack.c.l.b16 %v713_v47  ;;  %v2300_v16 = vunpack.c.l.b16 %v714_v18  ;;  %v2070_v54 = vunpack.c.l.b16 %v1994_v35  ;;  %v5374_v18 = vld [vmem:[#allocation10_spill] sm:$0xff] }
 0x2ad   :  { %3726 = vpow2.f32 %v1742_v6  ;;  %v711_v6 = vpack.c.bf16 %v4420_v52, %v4420_v52  ;;  %v1992_v10 = vpack.c.bf16 %v1944_v20, %v1944_v20  ;;  %v2272_v52 = vunpack.c.l.b16 %v712_v8 }
 0x2ae   :  { %v3721_v34 = vpop.eup %3720  ;;  %v717_v47 = vpack.c.bf16 %v5373_v40, %v5373_v40  ;;  %v718_v35 = vpack.c.bf16 %v5374_v18, %v5374_v18 }
 0x2af   :  { %v1947_v44 = vmul.f32 %v3721_v34, %v4726_v38  ;;  %v1772_v26 = vpop.xlane.xlu1 %1771  ;;  %1873 = vadd.xlane.f32.xlu2 %v1872_v7 }
 0x2b0   :  { %3728 = vrcp.f32 %v1772_v26  ;;  %v2271_v26 = vunpack.c.l.b16 %v711_v6 }
 0x2b1   :  { %v3723_v37 = vpop.eup %3722  ;;  %3730 = vrcp.f32 %v1766_v53  ;;  %v1995_v49 = vpack.c.bf16 %v1947_v44, %v1947_v44  ;;  %v2301_v44 = vpack.c.b16 %v2300_v16, %v2299_v22  ;;  %v2355_v16 = vunpack.c.l.b16 %v717_v47 }
 0x2b2   :  { %v3725_v23 = vpop.eup %3724  ;;  %v1951_v58 = vmul.f32 %v3723_v37, %v4735_v14  ;;  %v1796_v29 = vpop.xlane.xlu2 %1795  ;;  %v2042_v37 = vunpack.c.l.b16 %v1992_v10 }
 0x2b3   :  { %v4954_v30 = vpop.eup %3726  ;;  %v2071_v38 = vunpack.c.l.b16 %v1995_v49  ;;  %v1945_v34 = vmul.f32 %v3725_v23, %v4729_v27  ;;  %v1778_v7 = vpop.xlane.xlu0 %1777  ;;  %v2273_v23 = vpack.c.b16 %v2272_v52, %v2271_v26  ;;  %v5376_v26 = vld [vmem:[#allocation16_spill] sm:$0xff] }
 0x2b4   :  { %v1881_v20 = vsel %vm1463_vm2, %v4954_v30, 0.0  ;;  %v1999_v27 = vpack.c.bf16 %v1951_v58, %v1951_v58  ;;  %v5375_v58 = vld [vmem:[#allocation15_spill] sm:$0xff]  ;;  %v716_v52 = vpack.c.bf16 %v5376_v26, %v5376_v26 }
 0x2b5   :  { %v2072_v62 = vpack.c.b16 %v2071_v38, %v2070_v54  ;;  %v1993_v0 = vpack.c.bf16 %v1945_v34, %v1945_v34  ;;  %v2356_v54 = vunpack.c.l.b16 %v718_v35 }
 0x2b6   :  { %v3729_v53 = vpop.eup %3728  ;;  %v2127_v34 = vunpack.c.l.b16 %v1999_v27  ;;  %v2328_v27 = vunpack.c.l.b16 %v716_v52  ;;  %v5379_v52 = vld [vmem:[#allocation31_spill] sm:$0xff] }
 0x2b7   :  { %v3731_v14 = vpop.eup %3730  ;;  %v2043_v49 = vunpack.c.l.b16 %v1993_v0  ;;  %v1950_v6 = vmul.f32 %v3729_v53, %v4741_v11  ;;  %3561 = vmatmul.msk.bf16.vlgmr.msrb.gmra.mxu1 %vm1463_vm2, %v2072_v62  ;;  %v1769_v8 = vpop.xlane.xlu1 %1768  ;;  %1882 = vadd.xlane.f32.xlu2 %v1881_v20  ;;  %v715_v53 = vpack.c.bf16 %v5375_v58, %v5375_v58 }
 0x2b8   :  { %2313 = vmatpush.bf16.msrb.mxu1 %v2301_v44  ;;  %3732 = vrcp.f32 %v1769_v8  ;;  %v1948_v38 = vmul.f32 %v3731_v14, %v4719_v31  ;;  %v2357_v44 = vpack.c.b16 %v2356_v54, %v2355_v16  ;;  %v5377_v16 = vld [vmem:[#allocation7_spill] sm:$0xff] }
 0x2b9   :  { %v2044_v40 = vpack.c.b16 %v2043_v49, %v2042_v37  ;;  %v1998_v22 = vpack.c.bf16 %v1950_v6, %v1950_v6  ;;  %3734 = vrcp.f32 %v1796_v29  ;;  %v2327_v37 = vunpack.c.l.b16 %v715_v53 }
 0x2ba   :  { %v1996_v47 = vpack.c.bf16 %v1948_v38, %v1948_v38  ;;  %v1793_v29 = vpop.xlane.xlu2 %1792  ;;  %v726_v54 = vpack.c.bf16 %v5377_v16, %v5377_v16 }
 0x2bb   :  { %v2126_v10 = vunpack.c.l.b16 %v1998_v22  ;;  %3560 = vmatmul.msk.bf16.vlgmr.msrb.gmra.mxu0 %vm1463_vm2, %v2044_v40  ;;  %v1799_v0 = vpop.xlane.xlu0 %1798  ;;  %v2329_v38 = vpack.c.b16 %v2328_v27, %v2327_v37 }
 0x2bc   :  { %2285 = vmatpush.bf16.msrb.mxu0 %v2273_v23  ;;  %3736 = vrcp.f32 %v1799_v0  ;;  %v2098_v49 = vunpack.c.l.b16 %v1996_v47  ;;  %v2468_v58 = vunpack.c.l.b16 %v726_v54  ;;  %v5384_v54 = vld [vmem:[#allocation21_spill] sm:$0xff] }
 0x2bd   :  { %v2128_v11 = vpack.c.b16 %v2127_v34, %v2126_v10 }
 0x2be   :  { %v3733_v62 = vpop.eup %3732 }
 0x2bf   :  { %v1949_v31 = vmul.f32 %v3733_v62, %v4756_v59  ;;  %3563 = vmatmul.msk.bf16.vlgmr.msrb.gmra.mxu3 %vm1463_vm2, %v2128_v11  ;;  %v1790_v18 = vpop.xlane.xlu1 %1789  ;;  %v3735_v35 = vpop.eup %3734  ;;  %v5378_v11 = vld [vmem:[#allocation14_spill] sm:$0xff] }
 0x2c0   :  { %2369 = vmatpush.bf16.msrb.mxu3 %v2357_v44  ;;  %3738 = vrcp.f32 %v1790_v18  ;;  %v1958_v6 = vmul.f32 %v3735_v35, %v4748_v61  ;;  %v725_v62 = vpack.c.bf16 %v5378_v11, %v5378_v11 }
 0x2c1   :  { %v1997_v20 = vpack.c.bf16 %v1949_v31, %v1949_v31  ;;  %3740 = vrcp.f32 %v1793_v29  ;;  %v5380_v29 = vld [vmem:[#allocation30_spill] sm:$0xff] }
 0x2c2   :  { %v3737_v14 = vpop.eup %3736  ;;  %3742 = vrcp.f32 %v1778_v7  ;;  %v2006_v34 = vpack.c.bf16 %v1958_v6, %v1958_v6  ;;  %v2467_v31 = vunpack.c.l.b16 %v725_v62  ;;  %v5382_v6 = vld [vmem:[#allocation23_spill] sm:$0xff] }
 0x2c3   :  { %v2099_v8 = vunpack.c.l.b16 %v1997_v20  ;;  %v1959_v23 = vmul.f32 %v3737_v14, %v4763_v48  ;;  %v5381_v14 = vld [vmem:[#allocation6_spill] sm:$0xff] }
 0x2c4   :  { %v2238_v26 = vunpack.c.l.b16 %v2006_v34  ;;  %v724_v37 = vpack.c.bf16 %v5381_v14, %v5381_v14  ;;  %v2469_v27 = vpack.c.b16 %v2468_v58, %v2467_v31 }
 0x2c5   :  { %v2100_v59 = vpack.c.b16 %v2099_v8, %v2098_v49  ;;  %v2007_v40 = vpack.c.bf16 %v1959_v23, %v1959_v23 }
 0x2c6   :  { %v3739_v22 = vpop.eup %3738 }
 0x2c7   :  { %3562 = vmatmul.msk.bf16.vlgmr.msrb.gmra.mxu2 %vm1463_vm2, %v2100_v59  ;;  %v1781_v10 = vpop.xlane.xlu1 %1780  ;;  %v3741_v0 = vpop.eup %3740  ;;  %v2239_v7 = vunpack.c.l.b16 %v2007_v40  ;;  %v1956_v48 = vmul.f32 %v3739_v22, %v4769_v43  ;;  %v720_v43 = vpack.c.bf16 %v5382_v6, %v5382_v6  ;;  %v5383_v59 = vld [vmem:[#allocation3_spill] sm:$0xff] }
 0x2c8   :  { %2341 = vmatpush.bf16.msrb.mxu2 %v2329_v38  ;;  %v3743_v61 = vpop.eup %3742  ;;  %3744 = vrcp.f32 %v1781_v10  ;;  %v1957_v44 = vmul.f32 %v3741_v0, %v5379_v52  ;;  %v1820_v47 = vpop.xlane.xlu0 %1819  ;;  %v723_v40 = vpack.c.bf16 %v5383_v59, %v5383_v59  ;;  %v719_v38 = vpack.c.bf16 %v5384_v54, %v5384_v54  ;;  %v5386_v59 = vld [vmem:[#allocation26_spill] sm:$0xff] }
 0x2c9   :  { %v1952_v18 = vmul.f32 %v3743_v61, %v5380_v29  ;;  %v2240_v35 = vpack.c.b16 %v2239_v7, %v2238_v26  ;;  %v2004_v20 = vpack.c.bf16 %v1956_v48, %v1956_v48  ;;  %v2440_v10 = vunpack.c.l.b16 %v724_v37 }
 0x2ca   :  { %v1802_v53 = vpop.xlane.xlu2 %1801  ;;  %v2005_v8 = vpack.c.bf16 %v1957_v44, %v1957_v44  ;;  %3746 = vrcp.f32 %v1820_v47  ;;  %v2384_v62 = vunpack.c.l.b16 %v720_v43  ;;  %v2439_v48 = vunpack.c.l.b16 %v723_v40  ;;  %v5385_v43 = vld [vmem:[#allocation24_spill] sm:$0xff] }
 0x2cb   :  { %v2000_v22 = vpack.c.bf16 %v1952_v18, %v1952_v18  ;;  %v2210_v34 = vunpack.c.l.b16 %v2004_v20  ;;  %3748 = vrcp.f32 %v1802_v53  ;;  %v2383_v52 = vunpack.c.l.b16 %v719_v38  ;;  %v5388_v38 = vld [vmem:[#allocation9_spill] sm:$0xff] }
 0x2cc   :  { %v2211_v61 = vunpack.c.l.b16 %v2005_v8  ;;  %v732_v8 = vpack.c.bf16 %v5385_v43, %v5385_v43  ;;  %v733_v40 = vpack.c.bf16 %v5386_v59, %v5386_v59 }
 0x2cd   :  { %v2154_v58 = vunpack.c.l.b16 %v2000_v22  ;;  %v2385_v29 = vpack.c.b16 %v2384_v62, %v2383_v52  ;;  %v5387_v22 = vld [vmem:[#allocation27_spill] sm:$0xff] }
 0x2ce   :  { %v3745_v49 = vpop.eup %3744  ;;  %v2212_v44 = vpack.c.b16 %v2211_v61, %v2210_v34 }
 0x2cf   :  { %3567 = vmatmul.msk.bf16.vlgmr.msra.gmra.mxu3 %vm1463_vm2, %v2240_v35  ;;  %v1784_v23 = vpop.xlane.xlu1 %1783  ;;  %v1953_v16 = vmul.f32 %v3745_v49, %v4777_v4  ;;  %v2441_v4 = vpack.c.b16 %v2440_v10, %v2439_v48  ;;  %v5389_v10 = vld [vmem:[#allocation22_spill] sm:$0xff]  ;;  %v5390_v48 = vld [vmem:[#allocation25_spill] sm:$0xff] }
 0x2d0   :  { %2481 = vmatpush.bf16.msra.mxu3 %v2469_v27  ;;  %v3747_v18 = vpop.eup %3746 }
 0x2d1   :  { %v2001_v0 = vpack.c.bf16 %v1953_v16, %v1953_v16  ;;  %v3749_v53 = vpop.eup %3748  ;;  %v1966_v37 = vmul.f32 %v3747_v18, %v4779_v12  ;;  %v734_v16 = vpack.c.bf16 %v5387_v22, %v5387_v22  ;;  %v728_v12 = vpack.c.bf16 %v5388_v38, %v5388_v38 }
 0x2d2   :  { %v1814_v11 = vpop.xlane.xlu2 %1813 }
 0x2d3   :  { %v1805_v7 = vpop.xlane.xlu0 %1804  ;;  %v2155_v26 = vunpack.c.l.b16 %v2001_v0  ;;  %v731_v0 = vpack.c.bf16 %v5389_v10, %v5389_v10 }
 0x2d4   :  { %3750 = vrcp.f32 %v1805_v7  ;;  %v2552_v7 = vunpack.c.l.b16 %v732_v8 }
 0x2d5   :  { %3752 = vrcp.f32 %v1784_v23  ;;  %v2156_v31 = vpack.c.b16 %v2155_v26, %v2154_v58  ;;  %v1960_v23 = vmul.f32 %v3749_v53, %v4787_v42  ;;  %v721_v58 = vpack.c.bf16 %v5390_v48, %v5390_v48  ;;  %v5391_v26 = vld [vmem:[#allocation20_spill] sm:$0xff] }
 0x2d6   :  { %3754 = vrcp.f32 %v1814_v11  ;;  %v2014_v11 = vpack.c.bf16 %v1966_v37, %v1966_v37  ;;  %v722_v52 = vpack.c.bf16 %v5391_v26, %v5391_v26 }
 0x2d7   :  { %3566 = vmatmul.msk.bf16.vlgmr.msra.gmra.mxu2 %vm1463_vm2, %v2212_v44  ;;  %v1823_v47 = vpop.xlane.xlu1 %1822  ;;  %3564 = vmatmul.msk.bf16.vlgmr.msra.gmra.mxu0 %vm1463_vm2, %v2156_v31  ;;  %v2008_v44 = vpack.c.bf16 %v1960_v23, %v1960_v23  ;;  %v2580_v31 = vunpack.c.l.b16 %v734_v16  ;;  %v2411_v8 = vunpack.c.l.b16 %v721_v58 }
 0x2d8   :  { %2453 = vmatpush.bf16.msra.mxu2 %v2441_v4  ;;  %3756 = vrcp.f32 %v1823_v47  ;;  %2397 = vmatpush.bf16.msra.mxu0 %v2385_v29  ;;  %v5392_v29 = vld [vmem:[#allocation13_spill] sm:$0xff]  ;;  %v2350_v37 = vunpack.c.l.b16 %v2014_v11  ;;  %v2412_v23 = vunpack.c.l.b16 %v722_v52 }
 0x2d9   :  { %v727_v47 = vpack.c.bf16 %v5392_v29, %v5392_v29  ;;  %v2266_v59 = vunpack.c.l.b16 %v2008_v44 }
 0x2da   :  { %v3751_v35 = vpop.eup %3750  ;;  %v1787_v20 = vpop.xlane.xlu2 %1786  ;;  %v2413_v48 = vpack.c.b16 %v2412_v23, %v2411_v8 }
 0x2db   :  { %v3753_v14 = vpop.eup %3752  ;;  %v1961_v27 = vmul.f32 %v3751_v35, %v4800_v36  ;;  %3758 = vrcp.f32 %v1787_v20  ;;  %v1817_v49 = vpop.xlane.xlu0 %1816  ;;  %v2495_v16 = vunpack.c.l.b16 %v727_v47 }
 0x2dc   :  { %v3755_v6 = vpop.eup %3754  ;;  %3760 = vrcp.f32 %v1817_v49  ;;  %v1954_v36 = vmul.f32 %v3753_v14, %v4793_v32  ;;  %v2579_v32 = vunpack.c.l.b16 %v733_v40 }
 0x2dd   :  { %v2009_v34 = vpack.c.bf16 %v1961_v27, %v1961_v27  ;;  %v1964_v42 = vmul.f32 %v3755_v6, %v4796_v15  ;;  %v2496_v15 = vunpack.c.l.b16 %v728_v12 }
 0x2de   :  { %v3757_v54 = vpop.eup %3756  ;;  %v2002_v35 = vpack.c.bf16 %v1954_v36, %v1954_v36  ;;  %v2581_v22 = vpack.c.b16 %v2580_v31, %v2579_v32 }
 0x2df   :  { %v1967_v62 = vmul.f32 %v3757_v54, %v4807_v17  ;;  %v1808_v61 = vpop.xlane.xlu1 %1807  ;;  %v2267_v17 = vunpack.c.l.b16 %v2009_v34  ;;  %v2012_v27 = vpack.c.bf16 %v1964_v42, %v1964_v42  ;;  %v2551_v42 = vunpack.c.l.b16 %v731_v0 }
 0x2e0   :  { %v2182_v12 = vunpack.c.l.b16 %v2002_v35  ;;  %3762 = vrcp.f32 %v1808_v61  ;;  %v5395_v35 = vld [vmem:[#allocation28_spill] sm:$0xff] }
 0x2e1   :  { %v3759_v4 = vpop.eup %3758  ;;  %v2015_v18 = vpack.c.bf16 %v1967_v62, %v1967_v62  ;;  %v2268_v36 = vpack.c.b16 %v2267_v17, %v2266_v59  ;;  %v2322_v10 = vunpack.c.l.b16 %v2012_v27  ;;  %v2553_v26 = vpack.c.b16 %v2552_v7, %v2551_v42  ;;  %v5393_v7 = vld [vmem:[#allocation18_spill] sm:$0xff] }
 0x2e2   :  { %v3761_v53 = vpop.eup %3760  ;;  %v1955_v20 = vmul.f32 %v3759_v4, %v4810_v56  ;;  %v1838_v14 = vpop.xlane.xlu2 %1837  ;;  %v2497_v56 = vpack.c.b16 %v2496_v15, %v2495_v16  ;;  %v739_v47 = vpack.c.bf16 %v5393_v7, %v5393_v7  ;;  %v730_v17 = vpack.c.bf16 %v5395_v35, %v5395_v35 }
 0x2e3   :  { %v2351_v49 = vunpack.c.l.b16 %v2015_v18  ;;  %v1965_v6 = vmul.f32 %v3761_v53, %v4815_v28  ;;  %v1844_v43 = vpop.xlane.xlu0 %1843  ;;  %3764 = vrcp.f32 %v1838_v14  ;;  %v5394_v18 = vld [vmem:[#allocation8_spill] sm:$0xff] }
 0x2e4   :  { %v2003_v40 = vpack.c.bf16 %v1955_v20, %v1955_v20  ;;  %3766 = vrcp.f32 %v1844_v43  ;;  %v740_v53 = vpack.c.bf16 %v5394_v18, %v5394_v18  ;;  %v2663_v23 = vunpack.c.l.b16 %v739_v47  ;;  %v5400_v18 = vld [vmem:[#allocation2_spill] sm:$0xff] }
 0x2e5   :  { %v2352_v54 = vpack.c.b16 %v2351_v49, %v2350_v37  ;;  %v2013_v38 = vpack.c.bf16 %v1965_v6, %v1965_v6  ;;  %v2524_v16 = vunpack.c.l.b16 %v730_v17 }
 0x2e6   :  { %v2183_v34 = vunpack.c.l.b16 %v2003_v40  ;;  %v3763_v44 = vpop.eup %3762  ;;  %v2664_v59 = vunpack.c.l.b16 %v740_v53  ;;  %v735_v53 = vpack.c.bf16 %v5400_v18, %v5400_v18 }
 0x2e7   :  { %v2323_v11 = vunpack.c.l.b16 %v2013_v38  ;;  %3571 = vmatmul.msk.bf16.vlgmr.msrb.gmra.mxu3 %vm1463_vm2, %v2352_v54  ;;  %v1826_v28 = vpop.xlane.xlu1 %1825  ;;  %3568 = vmatmul.msk.bf16.vlgmr.msrb.gmra.mxu0 %vm1463_vm2, %v2268_v36  ;;  %v1962_v32 = vmul.f32 %v3763_v44, %v4821_v39  ;;  %v5397_v54 = vld [vmem:[#allocation29_spill] sm:$0xff] }
 0x2e8   :  { %v2184_v62 = vpack.c.b16 %v2183_v34, %v2182_v12  ;;  %2593 = vmatpush.bf16.msrb.mxu3 %v2581_v22  ;;  %2509 = vmatpush.bf16.msrb.mxu0 %v2497_v56 }
 0x2e9   :  { %v2324_v58 = vpack.c.b16 %v2323_v11, %v2322_v10  ;;  %v3765_v0 = vpop.eup %3764  ;;  %v2010_v37 = vpack.c.bf16 %v1962_v32, %v1962_v32 }
 0x2ea   :  { %3565 = vmatmul.msk.bf16.vlgmr.msra.gmra.mxu1 %vm1463_vm2, %v2184_v62  ;;  %v3767_v4 = vpop.eup %3766  ;;  %v1972_v29 = vmul.f32 %v3765_v0, %v4830_v24  ;;  %v5396_v24 = vld [vmem:[#allocation17_spill] sm:$0xff] }
 0x2eb   :  { %v1841_v52 = vpop.xlane.xlu0 %1840  ;;  %3570 = vmatmul.msk.bf16.vlgmr.msrb.gmra.mxu2 %vm1463_vm2, %v2324_v58  ;;  %2425 = vmatpush.bf16.msra.mxu1 %v2413_v48  ;;  %v1974_v20 = vmul.f32 %v3767_v4, %v4828_v2  ;;  %v729_v6 = vpack.c.bf16 %v5396_v24, %v5396_v24  ;;  %v742_v2 = vpack.c.bf16 %v5397_v54, %v5397_v54  ;;  %v5399_v58 = vld [vmem:[#allocation4_spill] sm:$0xff]  ;;  %v5401_v54 = vld [vmem:[#allocation5_spill] sm:$0xff] }
 0x2ec   :  { %v1811_v61 = vpop.xlane.xlu2 %1810  ;;  %2565 = vmatpush.bf16.msrb.mxu2 %v2553_v26  ;;  %v2020_v43 = vpack.c.bf16 %v1972_v29, %v1972_v29  ;;  %v736_v26 = vpack.c.bf16 %v5399_v58, %v5399_v58 }
 0x2ed   :  { %3768 = vrcp.f32 %v1811_v61  ;;  %v2022_v38 = vpack.c.bf16 %v1974_v20, %v1974_v20  ;;  %v2665_v61 = vpack.c.b16 %v2664_v59, %v2663_v23 }
 0x2ee   :  { %3770 = vrcp.f32 %v1841_v52  ;;  %v2434_v62 = vunpack.c.l.b16 %v2020_v43  ;;  %v2608_v20 = vunpack.c.l.b16 %v736_v26 }
 0x2ef   :  { %3772 = vrcp.f32 %v1826_v28  ;;  %v1847_v31 = vpop.xlane.xlu1 %1846  ;;  %v5398_v28 = vld [vmem:[#allocation11_spill] sm:$0xff]  ;;  %v2462_v32 = vunpack.c.l.b16 %v2022_v38 }
 0x2f0   :  { %3774 = vrcp.f32 %v1847_v31  ;;  %v741_v42 = vpack.c.bf16 %v5398_v28, %v5398_v28 }
 0x2f3   :  { %v3769_v15 = vpop.eup %3768  ;;  %v1832_v10 = vpop.xlane.xlu0 %1831 }
 0x2f4   :  { %v3771_v14 = vpop.eup %3770  ;;  %v1963_v39 = vmul.f32 %v3769_v15, %v4845_v41  ;;  %v1829_v27 = vpop.xlane.xlu2 %1828  ;;  %v2294_v41 = vunpack.c.l.b16 %v2010_v37  ;;  %v2691_v15 = vunpack.c.l.b16 %v741_v42 }
 0x2f5   :  { %v3773_v49 = vpop.eup %3772  ;;  %v1973_v8 = vmul.f32 %v3771_v14, %v4843_v46  ;;  %3776 = vrcp.f32 %v1829_v27  ;;  %v2523_v46 = vunpack.c.l.b16 %v729_v6 }
 0x2f6   :  { %v2011_v40 = vpack.c.bf16 %v1963_v39, %v1963_v39  ;;  %v3775_v22 = vpop.eup %3774  ;;  %v1968_v36 = vmul.f32 %v3773_v49, %v4838_v57  ;;  %v2692_v57 = vunpack.c.l.b16 %v742_v2  ;;  %3778 = vrcp.f32 %v1832_v10 }
 0x2f7   :  { %v2021_v12 = vpack.c.bf16 %v1973_v8, %v1973_v8  ;;  %v1975_v56 = vmul.f32 %v3775_v22, %v4851_v33  ;;  %v1862_v11 = vpop.xlane.xlu1 %1861  ;;  %v2525_v4 = vpack.c.b16 %v2524_v16, %v2523_v46  ;;  %v2607_v49 = vunpack.c.l.b16 %v735_v53 }
 0x2f8   :  { %v2295_v34 = vunpack.c.l.b16 %v2011_v40  ;;  %v2016_v33 = vpack.c.bf16 %v1968_v36, %v1968_v36  ;;  %v2693_v14 = vpack.c.b16 %v2692_v57, %v2691_v15  ;;  %v738_v2 = vpack.c.bf16 %v5401_v54, %v5401_v54 }
 0x2f9   :  { %v2435_v48 = vunpack.c.l.b16 %v2021_v12  ;;  %v2023_v44 = vpack.c.bf16 %v1975_v56, %v1975_v56  ;;  %v2609_v8 = vpack.c.b16 %v2608_v20, %v2607_v49 }
 0x2fa   :  { %v2296_v52 = vpack.c.b16 %v2295_v34, %v2294_v41  ;;  %v2378_v37 = vunpack.c.l.b16 %v2016_v33  ;;  %v2636_v42 = vunpack.c.l.b16 %v738_v2 }
 0x2fb   :  { %v3777_v0 = vpop.eup %3776  ;;  %v2436_v31 = vpack.c.b16 %v2435_v48, %v2434_v62  ;;  %v2463_v29 = vunpack.c.l.b16 %v2023_v44 }
 0x2fc   :  { %v1969_v7 = vmul.f32 %v3777_v0, %v4854_v5  ;;  %v1868_v47 = vpop.xlane.xlu2 %1867  ;;  %3569 = vmatmul.msk.bf16.vlgmr.msrb.gmra.mxu1 %vm1463_vm2, %v2296_v52  ;;  %v3779_v24 = vpop.eup %3778 }
 0x2fd   :  { %3780 = vrcp.f32 %v1868_v47  ;;  %3574 = vmatmul.msk.bf16.vlgmr.msra.gmra.mxu2 %vm1463_vm2, %v2436_v31  ;;  %2537 = vmatpush.bf16.msrb.mxu1 %v2525_v4  ;;  %v2464_v35 = vpack.c.b16 %v2463_v29, %v2462_v32  ;;  %v1970_v22 = vmul.f32 %v3779_v24, %v4859_v55 }
 0x2fe   :  { %v2017_v17 = vpack.c.bf16 %v1969_v7, %v1969_v7  ;;  %2677 = vmatpush.bf16.msra.mxu2 %v2665_v61  ;;  %3782 = vrcp.f32 %v1862_v11  ;;  %v5402_v11 = vld [vmem:[#allocation12_spill] sm:$0xff] }
 0x2ff   :  { %v1871_v39 = vpop.xlane.xlu0 %1870  ;;  %3575 = vmatmul.msk.bf16.vlgmr.msra.gmra.mxu3 %vm1463_vm2, %v2464_v35  ;;  %v1835_v27 = vpop.xlane.xlu1 %1834  ;;  %v2018_v56 = vpack.c.bf16 %v1970_v22, %v1970_v22  ;;  %v737_v55 = vpack.c.bf16 %v5402_v11, %v5402_v11 }
 0x300   :  { %v2379_v5 = vunpack.c.l.b16 %v2017_v17  ;;  %3784 = vrcp.f32 %v1871_v39  ;;  %2705 = vmatpush.bf16.msra.mxu3 %v2693_v14 }
 0x301   :  { %3786 = vrcp.f32 %v1835_v27  ;;  %v2406_v61 = vunpack.c.l.b16 %v2018_v56  ;;  %v2635_v44 = vunpack.c.l.b16 %v737_v55 }
 0x302   :  { %v2380_v6 = vpack.c.b16 %v2379_v5, %v2378_v37 }
 0x303   :  { %v3781_v43 = vpop.eup %3780  ;;  %v2637_v31 = vpack.c.b16 %v2636_v42, %v2635_v44 }
 0x304   :  { %v1982_v23 = vmul.f32 %v3781_v43, %v4873_v25  ;;  %v1865_v59 = vpop.xlane.xlu2 %1864  ;;  %3572 = vmatmul.msk.bf16.vlgmr.msra.gmra.mxu0 %vm1463_vm2, %v2380_v6  ;;  %v3783_v40 = vpop.eup %3782 }
 0x305   :  { %3788 = vrcp.f32 %v1865_v59  ;;  %2621 = vmatpush.bf16.msra.mxu0 %v2609_v8  ;;  %v1980_v12 = vmul.f32 %v3783_v40, %v4866_v19 }
 0x306   :  { %v3785_v16 = vpop.eup %3784  ;;  %v2030_v41 = vpack.c.bf16 %v1982_v23, %v1982_v23 }
 0x307   :  { %v3787_v38 = vpop.eup %3786  ;;  %v1983_v36 = vmul.f32 %v3785_v16, %v4880_v1  ;;  %v1850_v34 = vpop.xlane.xlu0 %1849  ;;  %v2028_v48 = vpack.c.bf16 %v1980_v12, %v1980_v12 }
 0x308   :  { %v1853_v25 = vpop.xlane.xlu1 %1852  ;;  %v1971_v10 = vmul.f32 %v3787_v38, %v4878_v45  ;;  %3790 = vrcp.f32 %v1850_v34  ;;  %v2574_v58 = vunpack.c.l.b16 %v2030_v41 }
 0x309   :  { %v2031_v46 = vpack.c.bf16 %v1983_v36, %v1983_v36  ;;  %3792 = vrcp.f32 %v1853_v25  ;;  %v2546_v33 = vunpack.c.l.b16 %v2028_v48  ;;  %v5403_v36 = vld [vmem:[#allocation32_spill] sm:$0xff] }
 0x30a   :  { %v2019_v62 = vpack.c.bf16 %v1971_v10, %v1971_v10 }
 0x30b   :  { %v3789_v28 = vpop.eup %3788  ;;  %v2575_v19 = vunpack.c.l.b16 %v2031_v46 }
 0x30c   :  { %v1981_v26 = vmul.f32 %v3789_v28, %v4887_v63  ;;  %v1856_v1 = vpop.xlane.xlu2 %1855  ;;  %v2407_v52 = vunpack.c.l.b16 %v2019_v62  ;;  %v5404_v28 = vld [vmem:[#allocation33_spill] sm:$0xff] }
 0x30d   :  { %3794 = vrcp.f32 %v1856_v1  ;;  %v2576_v45 = vpack.c.b16 %v2575_v19, %v2574_v58  ;;  %v5405_v19 = vld [vmem:[#allocation35_spill] sm:$0xff] }
 0x30e   :  { %v2029_v0 = vpack.c.bf16 %v1981_v26, %v1981_v26  ;;  %v3791_v4 = vpop.eup %3790  ;;  %v2408_v57 = vpack.c.b16 %v2407_v52, %v2406_v61 }
 0x30f   :  { %v3793_v32 = vpop.eup %3792  ;;  %v1976_v7 = vmul.f32 %v3791_v4, %v4889_v60  ;;  %v1859_v47 = vpop.xlane.xlu0 %1858  ;;  %3579 = vmatmul.msk.bf16.vlgmr.msrb.gmra.mxu3 %vm1463_vm2, %v2576_v45  ;;  %v5406_v45 = vld [vmem:[#allocation34_spill] sm:$0xff] }
 0x310   :  { %v2547_v29 = vunpack.c.l.b16 %v2029_v0  ;;  %v1892_v18 = vpop.xlane.xlu1 %1891  ;;  %v1977_v63 = vmul.f32 %v3793_v32, %v4893_v51  ;;  %3796 = vrcp.f32 %v1859_v47  ;;  %3573 = vmatmul.msk.bf16.vlgmr.msra.gmra.mxu1 %vm1463_vm2, %v2408_v57 }
 0x311   :  { %v2024_v15 = vpack.c.bf16 %v1976_v7, %v1976_v7  ;;  %2649 = vmatpush.bf16.msra.mxu1 %v2637_v31  ;;  %3798 = vrcp.f32 %v1892_v18 }
 0x312   :  { %v2548_v53 = vpack.c.b16 %v2547_v29, %v2546_v33  ;;  %v2025_v17 = vpack.c.bf16 %v1977_v63, %v1977_v63 }
 0x313   :  { %v3795_v35 = vpop.eup %3794  ;;  %v2490_v20 = vunpack.c.l.b16 %v2024_v15 }
 0x314   :  { %v1978_v14 = vmul.f32 %v3795_v35, %v4902_v3  ;;  %3578 = vmatmul.msk.bf16.vlgmr.msrb.gmra.mxu2 %vm1463_vm2, %v2548_v53  ;;  %v2491_v60 = vunpack.c.l.b16 %v2025_v17 }
 0x316   :  { %v3797_v37 = vpop.eup %3796  ;;  %v2492_v5 = vpack.c.b16 %v2491_v60, %v2490_v20  ;;  %v2026_v39 = vpack.c.bf16 %v1978_v14, %v1978_v14  ;;  %v28_v14 = vld [vmem:[%s5248_s1 + $0x4] sm:$0x7]  ;;  %v30_v60 = vld [vmem:[%s5248_s1 + $0xc] sm:$0x7] }
 0x317   :  { %v1979_v51 = vmul.f32 %v3797_v37, %v4906_v50  ;;  %v1886_v27 = vpop.xlane.xlu0 %1885  ;;  %v3799_v43 = vpop.eup %3798  ;;  %v5096_v37 = vunpack.c.l.bf16 %v28_v14 }
 0x318   :  { %v1889_v49 = vpop.xlane.xlu1 %1888  ;;  %3800 = vrcp.f32 %v1886_v27  ;;  %3576 = vmatmul.msk.bf16.vlgmr.msrb.gmra.mxu0 %vm1463_vm2, %v2492_v5  ;;  %v2518_v8 = vunpack.c.l.b16 %v2026_v39  ;;  %v1990_v40 = vmul.f32 %v3799_v43, %v4909_v13  ;;  %v29_v27 = vld [vmem:[%s5248_s1 + $0x8] sm:$0x7] }
 0x319   :  { %v2027_v24 = vpack.c.bf16 %v1979_v51, %v1979_v51  ;;  %3802 = vrcp.f32 %v1889_v49  ;;  %v5098_v51 = vunpack.c.l.bf16 %v30_v60 }
 0x31a   :  { %v1895_v6 = vpop.xlane.xlu2 %1894  ;;  %v2038_v12 = vpack.c.bf16 %v1990_v40, %v1990_v40 }
 0x31b   :  { %v2519_v3 = vunpack.c.l.b16 %v2027_v24  ;;  %3804 = vrcp.f32 %v1895_v6  ;;  %v5107_v6 = vunpack.c.l.bf16 %v29_v27 }
 0x31c   :  { %v2686_v55 = vunpack.c.l.b16 %v2038_v12  ;;  %v32_v12 = vld [vmem:[%s5248_s1 + $0x14] sm:$0x7] }
 0x31d   :  { %v2520_v23 = vpack.c.b16 %v2519_v3, %v2518_v8 }
 0x31e   :  { %v3801_v59 = vpop.eup %3800 }
 0x31f   :  { %v3803_v22 = vpop.eup %3802  ;;  %v1988_v16 = vmul.f32 %v3801_v59, %v4918_v9  ;;  %v1877_v50 = vpop.xlane.xlu0 %1876 }
 0x320   :  { %v1989_v54 = vmul.f32 %v3803_v22, %v4920_v21  ;;  %3806 = vrcp.f32 %v1877_v50  ;;  %3577 = vmatmul.msk.bf16.vlgmr.msrb.gmra.mxu1 %vm1463_vm2, %v2520_v23  ;;  %v1880_v25 = vpop.xlane.xlu1 %1879  ;;  %v31_v23 = vld [vmem:[%s5248_s1 + $0x10] sm:$0x7] }
 0x321   :  { %v3805_v2 = vpop.eup %3804  ;;  %v2036_v38 = vpack.c.bf16 %v1988_v16, %v1988_v16  ;;  %v5114_v40 = vunpack.c.l.bf16 %v31_v23 }
 0x322   :  { %v2037_v41 = vpack.c.bf16 %v1989_v54, %v1989_v54  ;;  %v1991_v34 = vmul.f32 %v3805_v2, %v5403_v36  ;;  %v1874_v56 = vpop.xlane.xlu2 %1873  ;;  %v5125_v36 = vunpack.c.l.bf16 %v32_v12 }
 0x323   :  { %v2658_v10 = vunpack.c.l.b16 %v2036_v38  ;;  %3808 = vrcp.f32 %v1874_v56 }
 0x324   :  { %v2659_v13 = vunpack.c.l.b16 %v2037_v41  ;;  %v2039_v11 = vpack.c.bf16 %v1991_v34, %v1991_v34  ;;  %3810 = vrcp.f32 %v1880_v25 }
 0x326   :  { %v3807_v9 = vpop.eup %3806  ;;  %v2660_v46 = vpack.c.b16 %v2659_v13, %v2658_v10  ;;  %v2687_v21 = vunpack.c.l.b16 %v2039_v11 }
 0x327   :  { %v1985_v42 = vmul.f32 %v3807_v9, %v5404_v28 }
 0x328   :  { %v2688_v62 = vpack.c.b16 %v2687_v21, %v2686_v55  ;;  %3582 = vmatmul.msk.bf16.vlgmr.msra.gmra.mxu2 %vm1463_vm2, %v2660_v46 }
 0x329   :  { %v3809_v48 = vpop.eup %3808  ;;  %v2033_v58 = vpack.c.bf16 %v1985_v42, %v1985_v42 }
 0x32a   :  { %v1984_v26 = vmul.f32 %v3809_v48, %v5405_v19  ;;  %v1883_v1 = vpop.xlane.xlu2 %1882  ;;  %3583 = vmatmul.msk.bf16.vlgmr.msra.gmra.mxu3 %vm1463_vm2, %v2688_v62  ;;  %v3811_v61 = vpop.eup %3810 }
 0x32b   :  { %3812 = vrcp.f32 %v1883_v1  ;;  %v2603_v44 = vunpack.c.l.b16 %v2033_v58  ;;  %v1986_v0 = vmul.f32 %v3811_v61, %v5406_v45 }
 0x32c   :  { %v2032_v52 = vpack.c.bf16 %v1984_v26, %v1984_v26 }
 0x32d   :  { %v2034_v31 = vpack.c.bf16 %v1986_v0, %v1986_v0 }
 0x32e   :  { %v2602_v4 = vunpack.c.l.b16 %v2032_v52 }
 0x32f   :  { %v2630_v47 = vunpack.c.l.b16 %v2034_v31 }
 0x330   :  { %v2604_v57 = vpack.c.b16 %v2603_v44, %v2602_v4 }
 0x331   :  { %v3813_v32 = vpop.eup %3812 }
 0x332   :  { %v1987_v33 = vmul.f32 %v3813_v32, %v4954_v30  ;;  %3580 = vmatmul.msk.bf16.vlgmr.msra.gmra.mxu0 %vm1463_vm2, %v2604_v57  ;;  %v27_v30 = vld [vmem:[%s5248_s1] sm:$0x7]  ;;  %s3814_s1 = smov 8  }
 0x333   :  { %v5086_v20 = vunpack.c.l.bf16 %v27_v30 }
 0x334   :  { %v2035_v29 = vpack.c.bf16 %v1987_v33, %v1987_v33  ;;  %v2091_v7 = vpop.f32.mrf.mxu1 }
 0x336   :  { %v2631_v18 = vunpack.c.l.b16 %v2035_v29 }
 0x338   :  { %v2632_v63 = vpack.c.b16 %v2631_v18, %v2630_v47  ;;  %v2063_v53 = vpop.f32.mrf.mxu0 }
 0x33a   :  { %3581 = vmatmul.msk.bf16.vlgmr.msra.gmra.mxu1 %vm1463_vm2, %v2632_v63 }
 0x33c   :  { %v2093_v15 = vpop.f32.mrf.mxu1 }
 0x33d   :  { %2758 = vmatpush.msrb.mxu1 %v2093_v15 }
 0x33f   :  { %2759 = vmatpush.msrb.mxu1 %v2091_v7 }
 0x340   :  { %v2065_v35 = vpop.f32.mrf.mxu0 }
 0x341   :  { %2735 = vmatpush.msrb.mxu0 %v2065_v35 }
 0x342   :  { %v2147_v17 = vpop.f32.mrf.mxu3 }
 0x343   :  { %2736 = vmatpush.msrb.mxu0 %v2063_v53 }
 0x344   :  { %3584 = vmatmul.msk.f32.vlgmr.msrb.gmra.mxu0 %vm1463_vm2, %v5086_v20 }
 0x34a   :  { %v2119_v5 = vpop.f32.mrf.mxu2  ;;  %v2149_v39 = vpop.f32.mrf.mxu3  ;;  %3585 = vmatmul.msk.f32.vlgmr.msrb.gmra.mxu1 %vm1463_vm2, %v5096_v37 }
 0x34b   :  { %2804 = vmatpush.msrb.mxu3 %v2149_v39 }
 0x34d   :  { %2805 = vmatpush.msrb.mxu3 %v2147_v17 }
 0x34e   :  { %3587 = vmatmul.msk.f32.vlgmr.msrb.gmra.mxu3 %vm1463_vm2, %v5098_v51 }
 0x352   :  { %v2121_v49 = vpop.f32.mrf.mxu2  ;;  %v2259_v24 = vpop.f32.mrf.mxu3 }
 0x353   :  { %2781 = vmatpush.msrb.mxu2 %v2121_v49 }
 0x354   :  { %v2175_v43 = vpop.f32.mrf.mxu0 }
 0x355   :  { %2782 = vmatpush.msrb.mxu2 %v2119_v5 }
 0x356   :  { %3586 = vmatmul.msk.f32.vlgmr.msrb.gmra.mxu2 %vm1463_vm2, %v5107_v6 }
 0x35a   :  { %v2231_v8 = vpop.f32.mrf.mxu2  ;;  %v2261_v3 = vpop.f32.mrf.mxu3 }
 0x35b   :  { %2890 = vmatpush.msra.mxu3 %v2261_v3 }
 0x35c   :  { %v2177_v59 = vpop.f32.mrf.mxu0 }
 0x35d   :  { %2891 = vmatpush.msra.mxu3 %v2259_v24  ;;  %2827 = vmatpush.msra.mxu0 %v2177_v59 }
 0x35e   :  { %3591 = vmatmul.msk.f32.vlgmr.msra.gmra.mxu3 %vm1463_vm2, %v5096_v37 }
 0x35f   :  { %2828 = vmatpush.msra.mxu0 %v2175_v43 }
 0x360   :  { %3588 = vmatmul.msk.f32.vlgmr.msra.gmra.mxu0 %vm1463_vm2, %v5114_v40 }
 0x362   :  { %v2233_v22 = vpop.f32.mrf.mxu2 }
 0x363   :  { %2870 = vmatpush.msra.mxu2 %v2233_v22 }
 0x364   :  { %v2287_v16 = vpop.f32.mrf.mxu0 }
 0x365   :  { %2871 = vmatpush.msra.mxu2 %v2231_v8 }
 0x366   :  { %3590 = vmatmul.msk.f32.vlgmr.msra.gmra.mxu2 %vm1463_vm2, %v5086_v20 }
 0x367   :  { %v2203_v50 = vpop.f32.mrf.mxu1 }
 0x36a   :  { %v2371_v54 = vpop.f32.mrf.mxu3 }
 0x36c   :  { %v2289_v2 = vpop.f32.mrf.mxu0 }
 0x36d   :  { %2910 = vmatpush.msrb.mxu0 %v2289_v2 }
 0x36e   :  { %v2343_v38 = vpop.f32.mrf.mxu2 }
 0x36f   :  { %v2205_v41 = vpop.f32.mrf.mxu1  ;;  %2911 = vmatpush.msrb.mxu0 %v2287_v16 }
 0x370   :  { %2850 = vmatpush.msra.mxu1 %v2205_v41  ;;  %3592 = vmatmul.msk.f32.vlgmr.msrb.gmra.mxu0 %vm1463_vm2, %v5107_v6 }
 0x372   :  { %v2373_v34 = vpop.f32.mrf.mxu3  ;;  %2851 = vmatpush.msra.mxu1 %v2203_v50 }
 0x373   :  { %2970 = vmatpush.msrb.mxu3 %v2373_v34  ;;  %3589 = vmatmul.msk.f32.vlgmr.msra.gmra.mxu1 %vm1463_vm2, %v5125_v36 }
 0x375   :  { %2971 = vmatpush.msrb.mxu3 %v2371_v54 }
 0x376   :  { %v2345_v25 = vpop.f32.mrf.mxu2  ;;  %3595 = vmatmul.msk.f32.vlgmr.msrb.gmra.mxu3 %vm1463_vm2, %v5125_v36 }
 0x377   :  { %2950 = vmatpush.msrb.mxu2 %v2345_v25 }
 0x379   :  { %v2315_v56 = vpop.f32.mrf.mxu1  ;;  %2951 = vmatpush.msrb.mxu2 %v2343_v38 }
 0x37a   :  { %3594 = vmatmul.msk.f32.vlgmr.msrb.gmra.mxu2 %vm1463_vm2, %v5114_v40 }
 0x380   :  { %v2455_v10 = vpop.f32.mrf.mxu2 }
 0x381   :  { %v2317_v13 = vpop.f32.mrf.mxu1  ;;  %v2399_v11 = vpop.f32.mrf.mxu0 }
 0x382   :  { %2930 = vmatpush.msrb.mxu1 %v2317_v13  ;;  %v2483_v9 = vpop.f32.mrf.mxu3 }
 0x384   :  { %2931 = vmatpush.msrb.mxu1 %v2315_v56 }
 0x385   :  { %3593 = vmatmul.msk.f32.vlgmr.msrb.gmra.mxu1 %vm1463_vm2, %v5098_v51 }
 0x388   :  { %v2457_v55 = vpop.f32.mrf.mxu2 }
 0x389   :  { %3030 = vmatpush.msra.mxu2 %v2457_v55  ;;  %v2401_v46 = vpop.f32.mrf.mxu0 }
 0x38a   :  { %2990 = vmatpush.msra.mxu0 %v2401_v46  ;;  %v2485_v21 = vpop.f32.mrf.mxu3 }
 0x38b   :  { %3031 = vmatpush.msra.mxu2 %v2455_v10  ;;  %3050 = vmatpush.msra.mxu3 %v2485_v21 }
 0x38c   :  { %3598 = vmatmul.msk.f32.vlgmr.msra.gmra.mxu2 %vm1463_vm2, %v5107_v6  ;;  %2991 = vmatpush.msra.mxu0 %v2399_v11 }
 0x38d   :  { %3596 = vmatmul.msk.f32.vlgmr.msra.gmra.mxu0 %vm1463_vm2, %v5086_v20  ;;  %v2427_v28 = vpop.f32.mrf.mxu1  ;;  %3051 = vmatpush.msra.mxu3 %v2483_v9 }
 0x38e   :  { %3599 = vmatmul.msk.f32.vlgmr.msra.gmra.mxu3 %vm1463_vm2, %v5098_v51 }
 0x392   :  { %v2595_v42 = vpop.f32.mrf.mxu3 }
 0x395   :  { %v2429_v62 = vpop.f32.mrf.mxu1  ;;  %v2511_v48 = vpop.f32.mrf.mxu0 }
 0x396   :  { %3010 = vmatpush.msra.mxu1 %v2429_v62 }
 0x397   :  { %v2567_v58 = vpop.f32.mrf.mxu2 }
 0x398   :  { %3011 = vmatpush.msra.mxu1 %v2427_v28 }
 0x399   :  { %3597 = vmatmul.msk.f32.vlgmr.msra.gmra.mxu1 %vm1463_vm2, %v5096_v37 }
 0x39a   :  { %v2597_v19 = vpop.f32.mrf.mxu3 }
 0x39b   :  { %3130 = vmatpush.msrb.mxu3 %v2597_v19 }
 0x39d   :  { %v2513_v26 = vpop.f32.mrf.mxu0  ;;  %v2539_v1 = vpop.f32.mrf.mxu1  ;;  %3131 = vmatpush.msrb.mxu3 %v2595_v42 }
 0x39e   :  { %3070 = vmatpush.msrb.mxu0 %v2513_v26  ;;  %3603 = vmatmul.msk.f32.vlgmr.msrb.gmra.mxu3 %vm1463_vm2, %v5096_v37 }
 0x39f   :  { %v2569_v61 = vpop.f32.mrf.mxu2 }
 0x3a0   :  { %3110 = vmatpush.msrb.mxu2 %v2569_v61  ;;  %3071 = vmatpush.msrb.mxu0 %v2511_v48 }
 0x3a1   :  { %3600 = vmatmul.msk.f32.vlgmr.msrb.gmra.mxu0 %vm1463_vm2, %v5114_v40 }
 0x3a2   :  { %3111 = vmatpush.msrb.mxu2 %v2567_v58  ;;  %v3818_v58 = vmov 1934713408  }
 0x3a3   :  { %3602 = vmatmul.msk.f32.vlgmr.msrb.gmra.mxu2 %vm1463_vm2, %v5086_v20  ;;  %v3331_v19 = vunpack.c.l.s4 %v3818_v58 }
 0x3a5   :  { %v2541_v52 = vpop.f32.mrf.mxu1 }
 0x3a6   :  { %3090 = vmatpush.msrb.mxu1 %v2541_v52 }
 0x3a8   :  { %3091 = vmatpush.msrb.mxu1 %v2539_v1 }
 0x3a9   :  { %3601 = vmatmul.msk.f32.vlgmr.msrb.gmra.mxu1 %vm1463_vm2, %v5125_v36 }
 0x3ab   :  { %v2679_v44 = vpop.f32.mrf.mxu2 }
 0x3ad   :  { %v2707_v45 = vpop.f32.mrf.mxu3 }
 0x3af   :  { %v2623_v0 = vpop.f32.mrf.mxu0 }
 0x3b3   :  { %v2681_v4 = vpop.f32.mrf.mxu2 }
 0x3b4   :  { %3190 = vmatpush.msra.mxu2 %v2681_v4  ;;  %v5192_v4 = vunpack.c.0.s8 %v3331_v19 }
 0x3b5   :  { %v2709_v57 = vpop.f32.mrf.mxu3 }
 0x3b6   :  { %3191 = vmatpush.msra.mxu2 %v2679_v44  ;;  %3210 = vmatpush.msra.mxu3 %v2709_v57 }
 0x3b7   :  { %3606 = vmatmul.msk.f32.vlgmr.msra.gmra.mxu2 %vm1463_vm2, %v5114_v40  ;;  %v2625_v32 = vpop.f32.mrf.mxu0  ;;  %v2651_v31 = vpop.f32.mrf.mxu1 }
 0x3b8   :  { %3150 = vmatpush.msra.mxu0 %v2625_v32  ;;  %3211 = vmatpush.msra.mxu3 %v2707_v45 }
 0x3b9   :  { %3607 = vmatmul.msk.f32.vlgmr.msra.gmra.mxu3 %vm1463_vm2, %v5125_v36  ;;  %v3817_v36 = vmov 1983009808  }
 0x3ba   :  { %3151 = vmatpush.msra.mxu0 %v2623_v0  ;;  %v3313_v34 = vunpack.c.l.s4 %v3817_v36 }
 0x3bb   :  { %3604 = vmatmul.msk.f32.vlgmr.msra.gmra.mxu0 %vm1463_vm2, %v5107_v6 }
 0x3bc   :  { %v5180_v9 = vunpack.c.0.s8 %v3313_v34 }
 0x3bf   :  { %v2653_v33 = vpop.f32.mrf.mxu1 }
 0x3c0   :  { %3170 = vmatpush.msra.mxu1 %v2653_v33 }
 0x3c1   :  { %v5163_v7 = vpop.f32.mrf.mxu0 }
 0x3c2   :  { %3171 = vmatpush.msra.mxu1 %v2651_v31 }
 0x3c3   :  { %3605 = vmatmul.msk.f32.vlgmr.msra.gmra.mxu1 %vm1463_vm2, %v5098_v51 }
 0x3c7   :  { %v5167_v15 = vpop.f32.mrf.mxu1 }
 0x3d1   :  { %v5161_v29 = vpop.f32.mrf.mxu3 }
 0x3d9   :  { %v2784_v47 = vpop.f32.mrf.mxu2 }
 0x3dd   :  { %v5165_v63 = vpop.f32.mrf.mxu0 }
 0x3e1   :  { %v2893_v18 = vpop.f32.mrf.mxu3 }
 0x3e2   :  { %3224 = vrot.lane.b32.xlu2 %v2893_v18, %s3814_s1 }
 0x3e9   :  { %v2873_v53 = vpop.f32.mrf.mxu2 }
 0x3ea   :  { %3222 = vrot.lane.b32.xlu0 %v2873_v53, %s3814_s1 }
 0x3ed   :  { %v2913_v35 = vpop.f32.mrf.mxu0 }
 0x3f0   :  { %v5169_v17 = vpop.f32.mrf.mxu1 }
 0x3f2   :  { %3226 = vrot.lane.b32.xlu0 %v2913_v35, %s3814_s1 }
 0x3f9   :  { %v2973_v30 = vpop.f32.mrf.mxu3 }
 0x3fa   :  { %3232 = vrot.lane.b32.xlu1 %v2973_v30, %s3814_s1 }
 0x3fd   :  { %v2953_v20 = vpop.f32.mrf.mxu2 }
 0x3fe   :  { %3230 = vrot.lane.b32.xlu0 %v2953_v20, %s3814_s1 }
 0x402   :  { %v2933_v14 = vpop.f32.mrf.mxu1 }
 0x403   :  { %3228 = vrot.lane.b32.xlu2 %v2933_v14, %s3814_s1 }
 0x40a   :  { %v2993_v60 = vpop.f32.mrf.mxu0 }
 0x40b   :  { %3246 = vrot.lane.b32.xlu0 %v2993_v60, %s3815_s4 }
 0x40f   :  { %v3033_v37 = vpop.f32.mrf.mxu2 }
 0x410   :  { %3250 = vrot.lane.b32.xlu2 %v3033_v37, %s3815_s4 }
 0x411   :  { %v3053_v5 = vpop.f32.mrf.mxu3 }
 0x416   :  { %v3013_v39 = vpop.f32.mrf.mxu1 }
 0x417   :  { %3248 = vrot.lane.b32.xlu1 %v3013_v39, %s3815_s4 }
 0x418   :  { %3252 = vrot.lane.b32.xlu2 %v3053_v5, %s3815_s4 }
 0x41e   :  { %v3073_v51 = vpop.f32.mrf.mxu0 }
 0x41f   :  { %3254 = vrot.lane.b32.xlu0 %v3073_v51, %s3815_s4 }
 0x421   :  { %v3133_v49 = vpop.f32.mrf.mxu3 }
 0x426   :  { %v3093_v27 = vpop.f32.mrf.mxu1  ;;  %v3113_v24 = vpop.f32.mrf.mxu2 }
 0x427   :  { %3256 = vrot.lane.b32.xlu1 %v3093_v27, %s3815_s4 }
 0x42f   :  { %3272 = vrot.lane.b32.xlu1 %v3133_v49, %s3816_s5 }
 0x438   :  { %v3153_v6 = vpop.f32.mrf.mxu0 }
 0x439   :  { %3274 = vrot.lane.b32.xlu2 %v3153_v6, %s3816_s5 }
 0x43a   :  { %v3193_v43 = vpop.f32.mrf.mxu2 }
 0x43b   :  { %3278 = vrot.lane.b32.xlu0 %v3193_v43, %s3816_s5 }
 0x43c   :  { %v3213_v8 = vpop.f32.mrf.mxu3  ;;  %v3225_v23 = vpop.permute.xlu2 %3224 }
 0x43d   :  { %3280 = vrot.lane.b32.xlu1 %v3213_v8, %s3816_s5  ;;  %v3289_v1 = vsel %vm75_vm1, %v5167_v15, %v3225_v23 }
 0x440   :  { %v3173_v3 = vpop.f32.mrf.mxu1 }
 0x441   :  { %3270 = vrot.lane.b32.xlu2 %v3113_v24, %s3816_s5 }
 0x445   :  { %3276 = vrot.lane.b32.xlu1 %v3173_v3, %s3816_s5 }
 0x45c   :  { %v3223_v40 = vpop.permute.xlu0 %3222 }
 0x45d   :  { %v5171_v59 = vpop.permute.xlu2 %3228  ;;  %v3288_v11 = vsel %vm75_vm1, %v5163_v7, %v3223_v40 }
 0x45e   :  { %v3291_v8 = vsel %vm75_vm1, %v5161_v29, %v5171_v59 }
 0x464   :  { %v3227_v16 = vpop.permute.xlu0 %3226 }
 0x465   :  { %v3290_v41 = vsel %vm75_vm1, %v2784_v47, %v3227_v16 }
 0x46a   :  { %v3251_v22 = vpop.permute.xlu2 %3250 }
 0x46b   :  { %v3296_v25 = vsel %vm1463_vm2, %v3290_v41, %v3251_v22 }
 0x46c   :  { %v3233_v50 = vpop.permute.xlu1 %3232 }
 0x46d   :  { %v3293_v6 = vsel %vm75_vm1, %v5169_v17, %v3233_v50 }
 0x470   :  { %v3231_v2 = vpop.permute.xlu0 %3230 }
 0x471   :  { %v3292_v60 = vsel %vm75_vm1, %v5165_v63, %v3231_v2 }
 0x472   :  { %v5173_v54 = vpop.permute.xlu2 %3252 }
 0x473   :  { %v3297_v23 = vsel %vm1463_vm2, %v3291_v8, %v5173_v54 }
 0x47d   :  { %v3247_v56 = vpop.permute.xlu0 %3246 }
 0x47e   :  { %v3294_v55 = vsel %vm1463_vm2, %v3288_v11, %v3247_v56 }
 0x489   :  { %v3249_v38 = vpop.permute.xlu1 %3248 }
 0x48a   :  { %v3295_v52 = vsel %vm1463_vm2, %v3289_v1, %v3249_v38 }
 0x491   :  { %v3255_v31 = vpop.permute.xlu0 %3254 }
 0x492   :  { %v3298_v5 = vsel %vm1463_vm2, %v3292_v60, %v3255_v31 }
 0x493   :  { %v3275_v12 = vpop.permute.xlu2 %3274 }
 0x494   :  { %v3303_v10 = vsel %vm3300_vm3, %v3296_v25, %v3275_v12 }
 0x495   :  { %v3307_v46 = vrot.slane %v3303_v10, 4 }
 0x499   :  { %v3257_v13 = vpop.permute.xlu1 %3256 }
 0x49a   :  { %v3299_v43 = vsel %vm1463_vm2, %v3293_v6, %v3257_v13 }
 0x49b   :  { %v3271_v21 = vpop.permute.xlu2 %3270 }
 0x49c   :  { %v3301_v28 = vsel %vm3300_vm3, %v3294_v55, %v3271_v21 }
 0x49d   :  { %v3309_v42 = vsel %vm3308_vm4, %v3307_v46, %v3301_v28  ;;  %v3310_v62 = vrot.slane %v3301_v28, 4 }
 0x49e   :  { %v3315_v48 = vperm.slane %v3309_v42, %v5180_v9 }
 0x49f   :  { %v3311_v26 = vsel %vm3308_vm4, %v3303_v10, %v3310_v62 }
 0x4a0   :  { %v3319_v61 = vperm.slane %v3311_v26, %v5180_v9  ;;  %v3328_v44 = vrot.slane %v3315_v48, 4 }
 0x4a1   :  { %v3273_v45 = vpop.permute.xlu1 %3272 }
 0x4a2   :  { %v3302_v0 = vsel %vm3300_vm3, %v3295_v52, %v3273_v45 }
 0x4a3   :  { %v3323_v57 = vperm.slane %v3302_v0, %v5180_v9  ;;  %v3324_v32 = vrot.slane %v3302_v0, 4 }
 0x4a5   :  { %v3325_v33 = vsel %vm3308_vm4, 0.0, %v3324_v32  ;;  %v3326_v7 = vrot.slane %v3323_v57, 4  ;;  %v3329_v47 = vsel %vm3308_vm4, %v3323_v57, %v3328_v44 }
 0x4a6   :  { %v3338_v18 = vrot.slane %v3325_v33, 4  ;;  %v3337_v53 = vperm.slane %v3329_v47, %v5192_v4 }
 0x4a7   :  { %v3327_v15 = vsel %vm3308_vm4, %v3326_v7, %v3315_v48 }
 0x4a8   :  { %v3339_v35 = vsel %vm3308_vm4, %v3338_v18, %v3319_v61  ;;  %3398 = vrot.lane.b32.xlu1 %v3337_v53, %s3819_s6  ;;  %v3333_v30 = vperm.slane %v3327_v15, %v5192_v4  ;;  %v3342_v46 = vrot.slane %v3337_v53, 4 }
 0x4a9   :  { %v3347_v20 = vperm.slane %v3339_v35, %v5192_v4 }
 0x4aa   :  { %v3340_v14 = vrot.slane %v3333_v30, 4  ;;  %v3343_v21 = vsel %vm3308_vm4, 0.0, %v3342_v46 }
 0x4ab   :  { %v3425_v58 = vrot.slane %v3347_v20, 4 }
 0x4ac   :  { %v3341_v37 = vsel %vm3308_vm4, 0.0, %v3340_v14 }
 0x4ad   :  { %v3279_v39 = vpop.permute.xlu0 %3278  ;;  %3390 = vrot.lane.b32.xlu0 %v3341_v37, %s3820_s7 }
 0x4ae   :  { %v3305_v51 = vsel %vm3300_vm3, %v3298_v5, %v3279_v39 }
 0x4af   :  { %v3364_v27 = vrot.slane %v3305_v51, 4  ;;  %v3281_v49 = vpop.permute.xlu1 %3280  ;;  %v3363_v3 = vperm.slane %v3305_v51, %v5180_v9 }
 0x4b0   :  { %v3306_v63 = vsel %vm3300_vm3, %v3299_v43, %v3281_v49 }
 0x4b1   :  { %v3365_v24 = vsel %vm3308_vm4, 0.0, %v3364_v27  ;;  %v3348_v40 = vrot.slane %v3306_v63, 4  ;;  %v3366_v50 = vrot.slane %v3363_v3, 4 }
 0x4b2   :  { %v3378_v41 = vrot.slane %v3365_v24, 4 }
 0x4b7   :  { %v3277_v22 = vpop.permute.xlu1 %3276 }
 0x4b8   :  { %v3304_v16 = vsel %vm3300_vm3, %v3297_v23, %v3277_v22 }
 0x4b9   :  { %v3349_v2 = vsel %vm3308_vm4, %v3348_v40, %v3304_v16  ;;  %v3350_v17 = vrot.slane %v3304_v16, 4 }
 0x4ba   :  { %v3355_v38 = vperm.slane %v3349_v2, %v5180_v9 }
 0x4bb   :  { %v3351_v12 = vsel %vm3308_vm4, %v3306_v63, %v3350_v17 }
 0x4bc   :  { %v3359_v29 = vperm.slane %v3351_v12, %v5180_v9  ;;  %v3368_v59 = vrot.slane %v3355_v38, 4  ;;  %v3367_v36 = vsel %vm3308_vm4, %v3366_v50, %v3355_v38 }
 0x4bd   :  { %v3373_v54 = vperm.slane %v3367_v36, %v5192_v4 }
 0x4be   :  { %v3369_v34 = vsel %vm3308_vm4, %v3363_v3, %v3368_v59  ;;  %v3379_v25 = vsel %vm3308_vm4, %v3378_v41, %v3359_v29 }
 0x4bf   :  { %v3377_v56 = vperm.slane %v3369_v34, %v5192_v4  ;;  %v3380_v10 = vrot.slane %v3373_v54, 4  ;;  %v3387_v13 = vperm.slane %v3379_v25, %v5192_v4 }
 0x4c1   :  { %3400 = vrot.lane.b32.xlu0 %v3377_v56, %s3819_s6  ;;  %v3381_v11 = vsel %vm3308_vm4, 0.0, %v3380_v10  ;;  %v3382_v55 = vrot.slane %v3377_v56, 4  ;;  %v3426_v0 = vrot.slane %v3387_v13, 4 }
 0x4c2   :  { %3392 = vrot.lane.b32.xlu2 %v3381_v11, %s3820_s7 }
 0x4c3   :  { %v3383_v9 = vsel %vm3308_vm4, 0.0, %v3382_v55 }
 0x4c4   :  { %3408 = vrot.lane.b32.xlu1 %v3383_v9, %s3821_s8 }
 0x4ca   :  { %3406 = vrot.lane.b32.xlu2 %v3343_v21, %s3821_s8 }
 0x51a   :  { %v3399_v48 = vpop.permute.xlu1 %3398 }
 0x51c   :  { %v3393_v28 = vpop.permute.xlu2 %3392 }
 0x51d   :  { %v3414_v44 = vsel %vm3412_vm5, %v3373_v54, %v3393_v28 }
 0x51f   :  { %v3391_v42 = vpop.permute.xlu0 %3390 }
 0x520   :  { %v3413_v62 = vsel %vm3412_vm5, %v3333_v30, %v3391_v42 }
 0x521   :  { %v3416_v26 = vsel %vm3415_vm6, %v3413_v62, %v3399_v48 }
 0x524   :  { %v3407_v19 = vpop.permute.xlu2 %3406 }
 0x525   :  { %v3419_v1 = vsel %vm3418_vm9, %v3416_v26, %v3407_v19 }
 0x526   :  { %v3427_v61 = vsel %vm94_vm0, %v3419_v1, %v3425_v58 }
 0x527   :  { %3434 = vst.msk [vmem:[%s5249_s3] sm:$0x77] %vm3433_vm10, %v3427_v61 }
 0x533   :  { %v3401_v52 = vpop.permute.xlu0 %3400 }
 0x534   :  { %v3417_v45 = vsel %vm3415_vm6, %v3414_v44, %v3401_v52 }
 0x536   :  { %v3409_v4 = vpop.permute.xlu1 %3408 }
 0x537   :  { %v3420_v57 = vsel %vm3418_vm9, %v3417_v45, %v3409_v4 }
 0x538   :  { %v3428_v32 = vsel %vm94_vm0, %v3420_v57, %v3426_v0 }
 0x539   :  { %3435 = vst.msk [vmem:[%s5249_s3 + $0x8] sm:$0x77] %vm3433_vm10, %v3428_v32 }

</bundles_post_ra>
